<compile_context>
chip_gen: v5e
topology: v5e:2x2
jax: 0.10.0
libtpu: 0.0.40
codegen_flags: <defaults>
</compile_context>

<pallas_src>
import math
from functools import partial

import jax
import jax.numpy as jnp
from jax import lax
from jax.experimental import pallas as pl
from jax.experimental.pallas import tpu as pltpu

# ---------------- config (small, consistent with the module) ----------------
VOCAB = 256          # vocab_size
BLOCK_SIZE = 16      # max positions
N_EMBED = 32         # hidden
N_LAYER = 2
N_HEAD = 4
B = 2                # batch
T = 8                # sequence length used at runtime (<= BLOCK_SIZE)
LN_EPS = 1e-5        # torch.nn.LayerNorm default
NEG_BIG = -1e30      # finite causal-mask bias (avoids inf-inf NaN hazard)


# ---------------- in-kernel helpers ----------------
def _layernorm(v, g, b):
    # one-pass stats: mean and mean-of-squares are independent reductions
    mu = jnp.mean(v, axis=-1, keepdims=True)
    ms = jnp.mean(v * v, axis=-1, keepdims=True)
    var = ms - mu * mu
    return (v - mu) * lax.rsqrt(var + LN_EPS) * g + b


def _gelu_tanh(x):
    # nn.GELU(approximate='tanh')
    return 0.5 * x * (1.0 + jnp.tanh(0.7978845608028654 * (x + 0.044715 * x * x * x)))


# ---------------- the fused Pallas kernel ----------------
def gpt2_fwd_kernel(tok_ref,           # (B*T, 1) int32 token ids
                    bias_ref,          # (N_LAYER, 8, 128) packed gains/biases
                    wqkv_ref,          # (N_LAYER, C, 3C)
                    wpr_ref,           # (N_LAYER, C, C)
                    wf1_ref,           # (N_LAYER, C, 4C)
                    wf2_ref,           # (N_LAYER, 4C, C)
                    wte_ref,           # (V, C)  tied embedding (gather side)
                    wte_t_ref,         # (C, V)  pre-transposed tied weight (lm_head side)
                    wpe_ref,           # (BLOCK_SIZE, C)
                    lmb_ref,           # (1, V)
                    logits_ref,        # (B*T, V) output
                    *, batch, seq, n_head):
    v_dim, c = wte_ref.shape
    bt = batch * seq
    hd = c // n_head
    scale = 1.0 / math.sqrt(hd)

    # ----- fused embedding: one-hot(tokens) @ wte + wpe[:T] -----
    tok = tok_ref[...]                                             # (BT, 1) int32
    vocab_iota = lax.broadcasted_iota(jnp.int32, (bt, v_dim), 1)
    onehot = (vocab_iota == tok).astype(jnp.float32)               # (BT, V)
    x = jnp.dot(onehot, wte_ref[...],
                preferred_element_type=jnp.float32)                # (BT, C)
    pos = wpe_ref[...][0:seq, :]                                   # (T, C) static slice
    x = (x.reshape(batch, seq, c) + pos[None, :, :]).reshape(bt, c)

    # Causal additive bias, hoisted out of the layer/head loops.
    row = lax.broadcasted_iota(jnp.int32, (seq, seq), 0)
    col = lax.broadcasted_iota(jnp.int32, (seq, seq), 1)
    causal_bias = jnp.where(col <= row, 0.0, NEG_BIG).astype(jnp.float32)   # (T, T)

    for l in range(N_LAYER):                                       # static unroll
        # unpack this layer's small vectors (one (8,128) vreg load, static slices)
        bias_l = bias_ref[l]                                       # (8, 128)
        g1   = bias_l[0:1, :c]
        b1   = bias_l[1:2, :c]
        bqkv = bias_l[2:3, :3 * c]
        bpr  = bias_l[3:4, :c]
        g2   = bias_l[4:5, :c]
        b2   = bias_l[5:6, :c]
        bf1  = bias_l[6:7, :4 * c]
        bf2  = bias_l[7:8, :c]

        # ----- LN1 + causal multi-head self-attention -----
        h = _layernorm(x, g1, b1)                                  # (BT, C)
        qkv = jnp.dot(h, wqkv_ref[l],
                      preferred_element_type=jnp.float32) + bqkv   # (BT, 3C)
        qkv3 = qkv.reshape(batch, seq, 3 * c)                      # (B, T, 3C)

        wpr_l = wpr_ref[l]                                         # (C, C)
        y_proj = jnp.zeros((bt, c), jnp.float32)
        for hh in range(n_head):    # static head loop; batched over B (3-D einsums)
            q = qkv3[:, :, hh * hd:(hh + 1) * hd]                  # (B, T, hd)
            k = qkv3[:, :, c + hh * hd:c + (hh + 1) * hd]
            v = qkv3[:, :, 2 * c + hh * hd:2 * c + (hh + 1) * hd]
            att = jnp.einsum('bqd,bkd->bqk', q, k,
                             preferred_element_type=jnp.float32) * scale   # (B, T, T)
            att = att + causal_bias[None, :, :]
            att = att - jnp.max(att, axis=-1, keepdims=True)
            p = jnp.exp(att)
            p = p * pl.reciprocal(jnp.sum(p, axis=-1, keepdims=True), approx=True)
            y_h = jnp.einsum('bqk,bkd->bqd', p, v,
                             preferred_element_type=jnp.float32)   # (B, T, hd)
            # Fold head-output placement into c_proj: no scratch, no concat.
            y_proj = y_proj + jnp.dot(y_h.reshape(bt, hd),
                                      wpr_l[hh * hd:(hh + 1) * hd, :],
                                      preferred_element_type=jnp.float32)
        x = x + y_proj + bpr                                       # residual 1

        # ----- LN2 + MLP -----
        h = _layernorm(x, g2, b2)
        h = jnp.dot(h, wf1_ref[l], preferred_element_type=jnp.float32) + bf1
        h = _gelu_tanh(h)
        h = jnp.dot(h, wf2_ref[l], preferred_element_type=jnp.float32) + bf2
        x = x + h                                                  # residual 2

    # ----- weight-tied lm_head: plain NN matmul against pre-transposed wte -----
    logits = jnp.dot(x, wte_t_ref[...], preferred_element_type=jnp.float32)  # (BT, V)
    logits_ref[...] = logits + lmb_ref[...]


# ---------------- pallas_call wrapper ----------------
def run_gpt2_kernel(tok_flat, params, wte_t, batch, seq):
    """tok_flat: (B*T, 1) int32. Returns logits (B*T, V)."""
    bt = batch * seq
    inputs = (tok_flat,
              params["bias_pack"],
              params["wqkv"], params["wpr"], params["wf1"], params["wf2"],
              params["wte"], wte_t, params["wpe"], params["lm_bias"])
    kernel = partial(gpt2_fwd_kernel, batch=batch, seq=seq, n_head=N_HEAD)
    # TODO(synk): on v7x, add a leading "parallel" grid axis over batch to use
    # the second TensorCore once B*T is large enough to pay for per-step cost.
    return pl.pallas_call(
        kernel,
        out_shape=jax.ShapeDtypeStruct((bt, VOCAB), jnp.float32),
        in_specs=[pl.BlockSpec(memory_space=pltpu.MemorySpace.VMEM)
                  for _ in inputs],
        out_specs=pl.BlockSpec(memory_space=pltpu.MemorySpace.VMEM),
    )(*inputs)


# ---------------- parameter init (deterministic, synthetic) ----------------
def _pack_biases(params):
    """Pack the 8 per-layer gain/bias vectors into one (N_LAYER, 8, 128) slab."""
    def pad128(v):
        v = v.reshape(-1)
        return jnp.pad(v, (0, 128 - v.shape[0]))

    layers = []
    for l in range(N_LAYER):
        layers.append(jnp.stack([
            pad128(params["g1"][l]),  pad128(params["b1"][l]),
            pad128(params["bqkv"][l]), pad128(params["bpr"][l]),
            pad128(params["g2"][l]),  pad128(params["b2"][l]),
            pad128(params["bf1"][l]), pad128(params["bf2"][l]),
        ]))
    return jnp.stack(layers)    # (N_LAYER, 8, 128)


def init_params(key):
    std = 0.02
    res_std = 0.02 * (2 * N_LAYER) ** -0.5   # NANOGPT_SCALE_INIT layers
    keys = jax.random.split(key, 2 + 4 * N_LAYER)
    params = {
        "wte": jax.random.normal(keys[0], (VOCAB, N_EMBED), jnp.float32) * std,
        "wpe": jax.random.normal(keys[1], (BLOCK_SIZE, N_EMBED), jnp.float32) * std,
        "lm_bias": jnp.zeros((1, VOCAB), jnp.float32),
        "g1": jnp.ones((N_LAYER, 1, N_EMBED), jnp.float32),
        "b1": jnp.zeros((N_LAYER, 1, N_EMBED), jnp.float32),
        "g2": jnp.ones((N_LAYER, 1, N_EMBED), jnp.float32),
        "b2": jnp.zeros((N_LAYER, 1, N_EMBED), jnp.float32),
        "bqkv": jnp.zeros((N_LAYER, 1, 3 * N_EMBED), jnp.float32),
        "bpr": jnp.zeros((N_LAYER, 1, N_EMBED), jnp.float32),
        "bf1": jnp.zeros((N_LAYER, 1, 4 * N_EMBED), jnp.float32),
        "bf2": jnp.zeros((N_LAYER, 1, N_EMBED), jnp.float32),
    }
    wqkv, wpr, wf1, wf2 = [], [], [], []
    for l in range(N_LAYER):
        k0, k1, k2, k3 = keys[2 + 4 * l: 6 + 4 * l]
        wqkv.append(jax.random.normal(k0, (N_EMBED, 3 * N_EMBED), jnp.float32) * std)
        wpr.append(jax.random.normal(k1, (N_EMBED, N_EMBED), jnp.float32) * res_std)
        wf1.append(jax.random.normal(k2, (N_EMBED, 4 * N_EMBED), jnp.float32) * std)
        wf2.append(jax.random.normal(k3, (4 * N_EMBED, N_EMBED), jnp.float32) * res_std)
    params["wqkv"] = jnp.stack(wqkv)
    params["wpr"] = jnp.stack(wpr)
    params["wf1"] = jnp.stack(wf1)
    params["wf2"] = jnp.stack(wf2)
    params["bias_pack"] = _pack_biases(params)
    return params


# ---------------- full forward (fused kernel + optional loss, one jit) ----------------
@jax.jit
def gpt2_forward(params, tokens, targets=None):
    bv, tv = tokens.shape
    tok_flat = tokens.reshape(bv * tv, 1).astype(jnp.int32)
    # Pre-transposed tied weight for the lm_head — derived from the SAME
    # parameter as the embedding table, so weight tying is preserved.
    wte_t = params["wte"].T                                        # (C, V)
    logits = run_gpt2_kernel(tok_flat, params, wte_t, bv, tv).reshape(bv, tv, VOCAB)
    loss = None
    if targets is not None:
        # TODO(synk): log_softmax + NLL could be fused into the kernel too; left
        # as XLA glue (tiny (B*T, V) reduction).
        logp = jax.nn.log_softmax(logits.reshape(-1, VOCAB), axis=-1)
        loss = -jnp.mean(jnp.take_along_axis(logp, targets.reshape(-1, 1), axis=-1))
    return logits, loss


# ---------------- pure-JAX reference for sanity checking ----------------
def _ref_forward(params, tokens):
    def ln(v, g, b):
        mu = v.mean(-1, keepdims=True)
        var = ((v - mu) ** 2).mean(-1, keepdims=True)
        return (v - mu) / jnp.sqrt(var + LN_EPS) * g + b

    x = jnp.take(params["wte"], tokens, axis=0) + params["wpe"][:tokens.shape[1]][None]
    bv, tv, cv = x.shape
    hd = cv // N_HEAD
    mask = jnp.tril(jnp.ones((tv, tv), bool))
    for l in range(N_LAYER):
        h = ln(x, params["g1"][l], params["b1"][l])
        qkv = h @ params["wqkv"][l] + params["bqkv"][l]
        q, k, v = jnp.split(qkv, 3, axis=-1)
        q = q.reshape(bv, tv, N_HEAD, hd).transpose(0, 2, 1, 3)
        k = k.reshape(bv, tv, N_HEAD, hd).transpose(0, 2, 1, 3)
        v = v.reshape(bv, tv, N_HEAD, hd).transpose(0, 2, 1, 3)
        att = (q @ k.transpose(0, 1, 3, 2)) / math.sqrt(hd)
        att = jnp.where(mask, att, -jnp.inf)
        att = jax.nn.softmax(att, axis=-1)
        y = (att @ v).transpose(0, 2, 1, 3).reshape(bv, tv, cv)
        x = x + (y @ params["wpr"][l] + params["bpr"][l])
        h = ln(x, params["g2"][l], params["b2"][l])
        h = h @ params["wf1"][l] + params["bf1"][l]
        h = 0.5 * h * (1 + jnp.tanh(0.7978845608028654 * (h + 0.044715 * h ** 3)))
        x = x + (h @ params["wf2"][l] + params["bf2"][l])
    return x @ params["wte"].T + params["lm_bias"]


if __name__ == "__main__":
    key = jax.random.PRNGKey(0)
    pkey, tkey, ykey = jax.random.split(key, 3)
    params = init_params(pkey)
    tokens = jax.random.randint(tkey, (B, T), 0, VOCAB, dtype=jnp.int32)
    targets = jax.random.randint(ykey, (B, T), 0, VOCAB, dtype=jnp.int32)

    logits, loss = gpt2_forward(params, tokens, targets)
    logits = jax.block_until_ready(logits)
    loss = jax.block_until_ready(loss)

    ref = _ref_forward(params, tokens)
    assert logits.shape == (B, T, VOCAB)
    # tolerance slightly relaxed vs 1e-4: softmax denom uses the EUP approx
    # reciprocal (pl.reciprocal(approx=True)); error is far below this bound.
    assert jnp.allclose(logits, ref, atol=1e-3, rtol=1e-2), "mismatch vs reference"
    assert jnp.isfinite(loss)
    print("KERNEL_OK")
</pallas_src>

<mosaic_0001>
module attributes {stable_mosaic.version = 11 : i64} {
  func.func @gpt2_fwd_kernel(%arg0: memref<16x1xi32, #tpu.memory_space<vmem>>, %arg1: memref<2x8x128xf32, #tpu.memory_space<vmem>>, %arg2: memref<2x32x96xf32, #tpu.memory_space<vmem>>, %arg3: memref<2x32x32xf32, #tpu.memory_space<vmem>>, %arg4: memref<2x32x128xf32, #tpu.memory_space<vmem>>, %arg5: memref<2x128x32xf32, #tpu.memory_space<vmem>>, %arg6: memref<256x32xf32, #tpu.memory_space<vmem>>, %arg7: memref<32x256xf32, #tpu.memory_space<vmem>>, %arg8: memref<16x32xf32, #tpu.memory_space<vmem>>, %arg9: memref<1x256xf32, #tpu.memory_space<vmem>>, %arg10: memref<16x256xf32, #tpu.memory_space<vmem>>) attributes {dimension_semantics = [], scalar_prefetch = 0 : i64, scratch_operands = 0 : i64, tpu.core_type = #tpu.core_type<tc>} {
    %c0 = arith.constant 0 : index
    %c0_0 = arith.constant 0 : index
    %0 = vector.load %arg0[%c0, %c0_0] : memref<16x1xi32, #tpu.memory_space<vmem>>, vector<16x1xi32>
    %1 = tpu.iota {dimensions = array<i32: 1>} : vector<16x256xi32>
    %2 = vector.broadcast %0 : vector<16x1xi32> to vector<16x256xi32>
    %3 = arith.cmpi eq, %1, %2 : vector<16x256xi32>
    %4 = arith.extui %3 : vector<16x256xi1> to vector<16x256xi32>
    %5 = arith.sitofp %4 : vector<16x256xi32> to vector<16x256xf32>
    %c0_1 = arith.constant 0 : index
    %c0_2 = arith.constant 0 : index
    %6 = vector.load %arg6[%c0_1, %c0_2] : memref<256x32xf32, #tpu.memory_space<vmem>>, vector<256x32xf32>
    %cst = arith.constant dense<0.000000e+00> : vector<16x32xf32>
    %7 = tpu.matmul %5, %6, %cst {dimension_numbers = #tpu.dot_dimension_numbers<[1], [0], [0], [1], [0, 0, 1, 1], [], []>} : vector<16x256xf32>, vector<256x32xf32>, vector<16x32xf32> -> vector<16x32xf32>
    %c0_3 = arith.constant 0 : index
    %c0_4 = arith.constant 0 : index
    %8 = vector.load %arg8[%c0_3, %c0_4] : memref<16x32xf32, #tpu.memory_space<vmem>>, vector<16x32xf32>
    %9 = vector.extract_strided_slice %8 {offsets = [0, 0], sizes = [8, 32], strides = [1, 1]} : vector<16x32xf32> to vector<8x32xf32>
    %10 = vector.shape_cast %7 : vector<16x32xf32> to vector<2x8x32xf32>
    %11 = vector.shape_cast %9 : vector<8x32xf32> to vector<1x8x32xf32>
    %12 = vector.broadcast %11 : vector<1x8x32xf32> to vector<2x8x32xf32>
    %13 = arith.addf %10, %12 : vector<2x8x32xf32>
    %14 = vector.shape_cast %13 : vector<2x8x32xf32> to vector<16x32xf32>
    %15 = tpu.iota {dimensions = array<i32: 0>} : vector<8x8xi32>
    %16 = tpu.iota {dimensions = array<i32: 1>} : vector<8x8xi32>
    %17 = arith.cmpi sle, %16, %15 : vector<8x8xi32>
    %cst_5 = arith.constant 0.000000e+00 : f32
    %cst_6 = arith.constant -1.000000e+30 : f32
    %18 = vector.broadcast %cst_5 : f32 to vector<8x8xf32>
    %19 = vector.broadcast %cst_6 : f32 to vector<8x8xf32>
    %20 = arith.select %17, %18, %19 : vector<8x8xi1>, vector<8x8xf32>
    %c0_7 = arith.constant 0 : index
    %c0_8 = arith.constant 0 : index
    %c0_9 = arith.constant 0 : index
    %21 = vector.load %arg1[%c0_7, %c0_8, %c0_9] : memref<2x8x128xf32, #tpu.memory_space<vmem>>, vector<1x8x128xf32>
    %22 = vector.shape_cast %21 : vector<1x8x128xf32> to vector<8x128xf32>
    %23 = vector.extract_strided_slice %22 {offsets = [0, 0], sizes = [1, 32], strides = [1, 1]} : vector<8x128xf32> to vector<1x32xf32>
    %24 = vector.extract_strided_slice %22 {offsets = [1, 0], sizes = [1, 32], strides = [1, 1]} : vector<8x128xf32> to vector<1x32xf32>
    %25 = vector.extract_strided_slice %22 {offsets = [2, 0], sizes = [1, 96], strides = [1, 1]} : vector<8x128xf32> to vector<1x96xf32>
    %26 = vector.extract_strided_slice %22 {offsets = [3, 0], sizes = [1, 32], strides = [1, 1]} : vector<8x128xf32> to vector<1x32xf32>
    %27 = vector.extract_strided_slice %22 {offsets = [4, 0], sizes = [1, 32], strides = [1, 1]} : vector<8x128xf32> to vector<1x32xf32>
    %28 = vector.extract_strided_slice %22 {offsets = [5, 0], sizes = [1, 32], strides = [1, 1]} : vector<8x128xf32> to vector<1x32xf32>
    %29 = vector.extract_strided_slice %22 {offsets = [6, 0], sizes = [1, 128], strides = [1, 1]} : vector<8x128xf32> to vector<1x128xf32>
    %30 = vector.extract_strided_slice %22 {offsets = [7, 0], sizes = [1, 32], strides = [1, 1]} : vector<8x128xf32> to vector<1x32xf32>
    %cst_10 = arith.constant dense<0.000000e+00> : vector<16xf32>
    %31 = vector.multi_reduction <add>, %14, %cst_10 [1] : vector<16x32xf32> to vector<16xf32>
    %32 = vector.shape_cast %31 : vector<16xf32> to vector<16x1xf32>
    %cst_11 = arith.constant 3.200000e+01 : f32
    %33 = vector.broadcast %cst_11 : f32 to vector<16x1xf32>
    %34 = arith.divf %32, %33 : vector<16x1xf32>
    %35 = arith.mulf %14, %14 : vector<16x32xf32>
    %cst_12 = arith.constant dense<0.000000e+00> : vector<16xf32>
    %36 = vector.multi_reduction <add>, %35, %cst_12 [1] : vector<16x32xf32> to vector<16xf32>
    %37 = vector.shape_cast %36 : vector<16xf32> to vector<16x1xf32>
    %cst_13 = arith.constant 3.200000e+01 : f32
    %38 = vector.broadcast %cst_13 : f32 to vector<16x1xf32>
    %39 = arith.divf %37, %38 : vector<16x1xf32>
    %40 = arith.mulf %34, %34 : vector<16x1xf32>
    %41 = arith.subf %39, %40 : vector<16x1xf32>
    %42 = vector.broadcast %34 : vector<16x1xf32> to vector<16x32xf32>
    %43 = arith.subf %14, %42 : vector<16x32xf32>
    %cst_14 = arith.constant 9.99999974E-6 : f32
    %44 = vector.broadcast %cst_14 : f32 to vector<16x1xf32>
    %45 = arith.addf %41, %44 : vector<16x1xf32>
    %46 = math.rsqrt %45 : vector<16x1xf32>
    %47 = vector.broadcast %46 : vector<16x1xf32> to vector<16x32xf32>
    %48 = arith.mulf %43, %47 : vector<16x32xf32>
    %49 = vector.broadcast %23 : vector<1x32xf32> to vector<16x32xf32>
    %50 = arith.mulf %48, %49 : vector<16x32xf32>
    %51 = vector.broadcast %24 : vector<1x32xf32> to vector<16x32xf32>
    %52 = arith.addf %50, %51 : vector<16x32xf32>
    %c0_15 = arith.constant 0 : index
    %c0_16 = arith.constant 0 : index
    %c0_17 = arith.constant 0 : index
    %53 = vector.load %arg2[%c0_15, %c0_16, %c0_17] : memref<2x32x96xf32, #tpu.memory_space<vmem>>, vector<1x32x96xf32>
    %54 = vector.shape_cast %53 : vector<1x32x96xf32> to vector<32x96xf32>
    %cst_18 = arith.constant dense<0.000000e+00> : vector<16x96xf32>
    %55 = tpu.matmul %52, %54, %cst_18 {dimension_numbers = #tpu.dot_dimension_numbers<[1], [0], [0], [1], [0, 0, 1, 1], [], []>} : vector<16x32xf32>, vector<32x96xf32>, vector<16x96xf32> -> vector<16x96xf32>
    %56 = vector.broadcast %25 : vector<1x96xf32> to vector<16x96xf32>
    %57 = arith.addf %55, %56 : vector<16x96xf32>
    %58 = vector.shape_cast %57 : vector<16x96xf32> to vector<2x8x96xf32>
    %c0_19 = arith.constant 0 : index
    %c0_20 = arith.constant 0 : index
    %c0_21 = arith.constant 0 : index
    %59 = vector.load %arg3[%c0_19, %c0_20, %c0_21] : memref<2x32x32xf32, #tpu.memory_space<vmem>>, vector<1x32x32xf32>
    %60 = vector.shape_cast %59 : vector<1x32x32xf32> to vector<32x32xf32>
    %cst_22 = arith.constant 0.000000e+00 : f32
    %61 = vector.broadcast %cst_22 : f32 to vector<16x32xf32>
    %62 = vector.extract_strided_slice %58 {offsets = [0, 0, 0], sizes = [2, 8, 8], strides = [1, 1, 1]} : vector<2x8x96xf32> to vector<2x8x8xf32>
    %63 = vector.extract_strided_slice %58 {offsets = [0, 0, 32], sizes = [2, 8, 8], strides = [1, 1, 1]} : vector<2x8x96xf32> to vector<2x8x8xf32>
    %64 = vector.extract_strided_slice %58 {offsets = [0, 0, 64], sizes = [2, 8, 8], strides = [1, 1, 1]} : vector<2x8x96xf32> to vector<2x8x8xf32>
    "tpu.trace_start"() <{level = 10 : i32, message = "bqd,bkd->bqk"}> : () -> ()
    %cst_23 = arith.constant dense<0.000000e+00> : vector<2x8x8xf32>
    %65 = tpu.matmul %62, %63, %cst_23 {dimension_numbers = #tpu.dot_dimension_numbers<[2], [2], [1], [1], [0, 0, 0, 1, 1, 1], [0], [0]>} : vector<2x8x8xf32>, vector<2x8x8xf32>, vector<2x8x8xf32> -> vector<2x8x8xf32>
    "tpu.trace_stop"() : () -> ()
    %cst_24 = arith.constant 0.353553385 : f32
    %66 = vector.broadcast %cst_24 : f32 to vector<2x8x8xf32>
    %67 = arith.mulf %65, %66 : vector<2x8x8xf32>
    %68 = vector.shape_cast %20 : vector<8x8xf32> to vector<1x8x8xf32>
    %69 = vector.broadcast %68 : vector<1x8x8xf32> to vector<2x8x8xf32>
    %70 = arith.addf %67, %69 : vector<2x8x8xf32>
    %cst_25 = arith.constant dense<0xFF800000> : vector<2x8xf32>
    %71 = vector.multi_reduction <maximumf>, %70, %cst_25 [2] : vector<2x8x8xf32> to vector<2x8xf32>
    %72 = vector.shape_cast %71 : vector<2x8xf32> to vector<2x8x1xf32>
    %73 = vector.broadcast %72 : vector<2x8x1xf32> to vector<2x8x8xf32>
    %74 = arith.subf %70, %73 : vector<2x8x8xf32>
    %75 = math.exp %74 : vector<2x8x8xf32>
    %cst_26 = arith.constant dense<0.000000e+00> : vector<2x8xf32>
    %76 = vector.multi_reduction <add>, %75, %cst_26 [2] : vector<2x8x8xf32> to vector<2x8xf32>
    %77 = vector.shape_cast %76 : vector<2x8xf32> to vector<2x8x1xf32>
    %78 = tpu.reciprocal %77 {approx = true} : vector<2x8x1xf32> -> vector<2x8x1xf32>
    %79 = vector.broadcast %78 : vector<2x8x1xf32> to vector<2x8x8xf32>
    %80 = arith.mulf %75, %79 : vector<2x8x8xf32>
    "tpu.trace_start"() <{level = 10 : i32, message = "bqk,bkd->bqd"}> : () -> ()
    %cst_27 = arith.constant dense<0.000000e+00> : vector<2x8x8xf32>
    %81 = tpu.matmul %80, %64, %cst_27 {dimension_numbers = #tpu.dot_dimension_numbers<[2], [1], [1], [2], [0, 0, 0, 1, 1, 2], [0], [0]>} : vector<2x8x8xf32>, vector<2x8x8xf32>, vector<2x8x8xf32> -> vector<2x8x8xf32>
    "tpu.trace_stop"() : () -> ()
    %82 = vector.shape_cast %81 : vector<2x8x8xf32> to vector<16x8xf32>
    %83 = vector.extract_strided_slice %60 {offsets = [0, 0], sizes = [8, 32], strides = [1, 1]} : vector<32x32xf32> to vector<8x32xf32>
    %cst_28 = arith.constant dense<0.000000e+00> : vector<16x32xf32>
    %84 = tpu.matmul %82, %83, %cst_28 {dimension_numbers = #tpu.dot_dimension_numbers<[1], [0], [0], [1], [0, 0, 1, 1], [], []>} : vector<16x8xf32>, vector<8x32xf32>, vector<16x32xf32> -> vector<16x32xf32>
    %85 = arith.addf %61, %84 : vector<16x32xf32>
    %86 = vector.extract_strided_slice %58 {offsets = [0, 0, 8], sizes = [2, 8, 8], strides = [1, 1, 1]} : vector<2x8x96xf32> to vector<2x8x8xf32>
    %87 = vector.extract_strided_slice %58 {offsets = [0, 0, 40], sizes = [2, 8, 8], strides = [1, 1, 1]} : vector<2x8x96xf32> to vector<2x8x8xf32>
    %88 = vector.extract_strided_slice %58 {offsets = [0, 0, 72], sizes = [2, 8, 8], strides = [1, 1, 1]} : vector<2x8x96xf32> to vector<2x8x8xf32>
    "tpu.trace_start"() <{level = 10 : i32, message = "bqd,bkd->bqk"}> : () -> ()
    %cst_29 = arith.constant dense<0.000000e+00> : vector<2x8x8xf32>
    %89 = tpu.matmul %86, %87, %cst_29 {dimension_numbers = #tpu.dot_dimension_numbers<[2], [2], [1], [1], [0, 0, 0, 1, 1, 1], [0], [0]>} : vector<2x8x8xf32>, vector<2x8x8xf32>, vector<2x8x8xf32> -> vector<2x8x8xf32>
    "tpu.trace_stop"() : () -> ()
    %cst_30 = arith.constant 0.353553385 : f32
    %90 = vector.broadcast %cst_30 : f32 to vector<2x8x8xf32>
    %91 = arith.mulf %89, %90 : vector<2x8x8xf32>
    %92 = vector.shape_cast %20 : vector<8x8xf32> to vector<1x8x8xf32>
    %93 = vector.broadcast %92 : vector<1x8x8xf32> to vector<2x8x8xf32>
    %94 = arith.addf %91, %93 : vector<2x8x8xf32>
    %cst_31 = arith.constant dense<0xFF800000> : vector<2x8xf32>
    %95 = vector.multi_reduction <maximumf>, %94, %cst_31 [2] : vector<2x8x8xf32> to vector<2x8xf32>
    %96 = vector.shape_cast %95 : vector<2x8xf32> to vector<2x8x1xf32>
    %97 = vector.broadcast %96 : vector<2x8x1xf32> to vector<2x8x8xf32>
    %98 = arith.subf %94, %97 : vector<2x8x8xf32>
    %99 = math.exp %98 : vector<2x8x8xf32>
    %cst_32 = arith.constant dense<0.000000e+00> : vector<2x8xf32>
    %100 = vector.multi_reduction <add>, %99, %cst_32 [2] : vector<2x8x8xf32> to vector<2x8xf32>
    %101 = vector.shape_cast %100 : vector<2x8xf32> to vector<2x8x1xf32>
    %102 = tpu.reciprocal %101 {approx = true} : vector<2x8x1xf32> -> vector<2x8x1xf32>
    %103 = vector.broadcast %102 : vector<2x8x1xf32> to vector<2x8x8xf32>
    %104 = arith.mulf %99, %103 : vector<2x8x8xf32>
    "tpu.trace_start"() <{level = 10 : i32, message = "bqk,bkd->bqd"}> : () -> ()
    %cst_33 = arith.constant dense<0.000000e+00> : vector<2x8x8xf32>
    %105 = tpu.matmul %104, %88, %cst_33 {dimension_numbers = #tpu.dot_dimension_numbers<[2], [1], [1], [2], [0, 0, 0, 1, 1, 2], [0], [0]>} : vector<2x8x8xf32>, vector<2x8x8xf32>, vector<2x8x8xf32> -> vector<2x8x8xf32>
    "tpu.trace_stop"() : () -> ()
    %106 = vector.shape_cast %105 : vector<2x8x8xf32> to vector<16x8xf32>
    %107 = vector.extract_strided_slice %60 {offsets = [8, 0], sizes = [8, 32], strides = [1, 1]} : vector<32x32xf32> to vector<8x32xf32>
    %cst_34 = arith.constant dense<0.000000e+00> : vector<16x32xf32>
    %108 = tpu.matmul %106, %107, %cst_34 {dimension_numbers = #tpu.dot_dimension_numbers<[1], [0], [0], [1], [0, 0, 1, 1], [], []>} : vector<16x8xf32>, vector<8x32xf32>, vector<16x32xf32> -> vector<16x32xf32>
    %109 = arith.addf %85, %108 : vector<16x32xf32>
    %110 = vector.extract_strided_slice %58 {offsets = [0, 0, 16], sizes = [2, 8, 8], strides = [1, 1, 1]} : vector<2x8x96xf32> to vector<2x8x8xf32>
    %111 = vector.extract_strided_slice %58 {offsets = [0, 0, 48], sizes = [2, 8, 8], strides = [1, 1, 1]} : vector<2x8x96xf32> to vector<2x8x8xf32>
    %112 = vector.extract_strided_slice %58 {offsets = [0, 0, 80], sizes = [2, 8, 8], strides = [1, 1, 1]} : vector<2x8x96xf32> to vector<2x8x8xf32>
    "tpu.trace_start"() <{level = 10 : i32, message = "bqd,bkd->bqk"}> : () -> ()
    %cst_35 = arith.constant dense<0.000000e+00> : vector<2x8x8xf32>
    %113 = tpu.matmul %110, %111, %cst_35 {dimension_numbers = #tpu.dot_dimension_numbers<[2], [2], [1], [1], [0, 0, 0, 1, 1, 1], [0], [0]>} : vector<2x8x8xf32>, vector<2x8x8xf32>, vector<2x8x8xf32> -> vector<2x8x8xf32>
    "tpu.trace_stop"() : () -> ()
    %cst_36 = arith.constant 0.353553385 : f32
    %114 = vector.broadcast %cst_36 : f32 to vector<2x8x8xf32>
    %115 = arith.mulf %113, %114 : vector<2x8x8xf32>
    %116 = vector.shape_cast %20 : vector<8x8xf32> to vector<1x8x8xf32>
    %117 = vector.broadcast %116 : vector<1x8x8xf32> to vector<2x8x8xf32>
    %118 = arith.addf %115, %117 : vector<2x8x8xf32>
    %cst_37 = arith.constant dense<0xFF800000> : vector<2x8xf32>
    %119 = vector.multi_reduction <maximumf>, %118, %cst_37 [2] : vector<2x8x8xf32> to vector<2x8xf32>
    %120 = vector.shape_cast %119 : vector<2x8xf32> to vector<2x8x1xf32>
    %121 = vector.broadcast %120 : vector<2x8x1xf32> to vector<2x8x8xf32>
    %122 = arith.subf %118, %121 : vector<2x8x8xf32>
    %123 = math.exp %122 : vector<2x8x8xf32>
    %cst_38 = arith.constant dense<0.000000e+00> : vector<2x8xf32>
    %124 = vector.multi_reduction <add>, %123, %cst_38 [2] : vector<2x8x8xf32> to vector<2x8xf32>
    %125 = vector.shape_cast %124 : vector<2x8xf32> to vector<2x8x1xf32>
    %126 = tpu.reciprocal %125 {approx = true} : vector<2x8x1xf32> -> vector<2x8x1xf32>
    %127 = vector.broadcast %126 : vector<2x8x1xf32> to vector<2x8x8xf32>
    %128 = arith.mulf %123, %127 : vector<2x8x8xf32>
    "tpu.trace_start"() <{level = 10 : i32, message = "bqk,bkd->bqd"}> : () -> ()
    %cst_39 = arith.constant dense<0.000000e+00> : vector<2x8x8xf32>
    %129 = tpu.matmul %128, %112, %cst_39 {dimension_numbers = #tpu.dot_dimension_numbers<[2], [1], [1], [2], [0, 0, 0, 1, 1, 2], [0], [0]>} : vector<2x8x8xf32>, vector<2x8x8xf32>, vector<2x8x8xf32> -> vector<2x8x8xf32>
    "tpu.trace_stop"() : () -> ()
    %130 = vector.shape_cast %129 : vector<2x8x8xf32> to vector<16x8xf32>
    %131 = vector.extract_strided_slice %60 {offsets = [16, 0], sizes = [8, 32], strides = [1, 1]} : vector<32x32xf32> to vector<8x32xf32>
    %cst_40 = arith.constant dense<0.000000e+00> : vector<16x32xf32>
    %132 = tpu.matmul %130, %131, %cst_40 {dimension_numbers = #tpu.dot_dimension_numbers<[1], [0], [0], [1], [0, 0, 1, 1], [], []>} : vector<16x8xf32>, vector<8x32xf32>, vector<16x32xf32> -> vector<16x32xf32>
    %133 = arith.addf %109, %132 : vector<16x32xf32>
    %134 = vector.extract_strided_slice %58 {offsets = [0, 0, 24], sizes = [2, 8, 8], strides = [1, 1, 1]} : vector<2x8x96xf32> to vector<2x8x8xf32>
    %135 = vector.extract_strided_slice %58 {offsets = [0, 0, 56], sizes = [2, 8, 8], strides = [1, 1, 1]} : vector<2x8x96xf32> to vector<2x8x8xf32>
    %136 = vector.extract_strided_slice %58 {offsets = [0, 0, 88], sizes = [2, 8, 8], strides = [1, 1, 1]} : vector<2x8x96xf32> to vector<2x8x8xf32>
    "tpu.trace_start"() <{level = 10 : i32, message = "bqd,bkd->bqk"}> : () -> ()
    %cst_41 = arith.constant dense<0.000000e+00> : vector<2x8x8xf32>
    %137 = tpu.matmul %134, %135, %cst_41 {dimension_numbers = #tpu.dot_dimension_numbers<[2], [2], [1], [1], [0, 0, 0, 1, 1, 1], [0], [0]>} : vector<2x8x8xf32>, vector<2x8x8xf32>, vector<2x8x8xf32> -> vector<2x8x8xf32>
    "tpu.trace_stop"() : () -> ()
    %cst_42 = arith.constant 0.353553385 : f32
    %138 = vector.broadcast %cst_42 : f32 to vector<2x8x8xf32>
    %139 = arith.mulf %137, %138 : vector<2x8x8xf32>
    %140 = vector.shape_cast %20 : vector<8x8xf32> to vector<1x8x8xf32>
    %141 = vector.broadcast %140 : vector<1x8x8xf32> to vector<2x8x8xf32>
    %142 = arith.addf %139, %141 : vector<2x8x8xf32>
    %cst_43 = arith.constant dense<0xFF800000> : vector<2x8xf32>
    %143 = vector.multi_reduction <maximumf>, %142, %cst_43 [2] : vector<2x8x8xf32> to vector<2x8xf32>
    %144 = vector.shape_cast %143 : vector<2x8xf32> to vector<2x8x1xf32>
    %145 = vector.broadcast %144 : vector<2x8x1xf32> to vector<2x8x8xf32>
    %146 = arith.subf %142, %145 : vector<2x8x8xf32>
    %147 = math.exp %146 : vector<2x8x8xf32>
    %cst_44 = arith.constant dense<0.000000e+00> : vector<2x8xf32>
    %148 = vector.multi_reduction <add>, %147, %cst_44 [2] : vector<2x8x8xf32> to vector<2x8xf32>
    %149 = vector.shape_cast %148 : vector<2x8xf32> to vector<2x8x1xf32>
    %150 = tpu.reciprocal %149 {approx = true} : vector<2x8x1xf32> -> vector<2x8x1xf32>
    %151 = vector.broadcast %150 : vector<2x8x1xf32> to vector<2x8x8xf32>
    %152 = arith.mulf %147, %151 : vector<2x8x8xf32>
    "tpu.trace_start"() <{level = 10 : i32, message = "bqk,bkd->bqd"}> : () -> ()
    %cst_45 = arith.constant dense<0.000000e+00> : vector<2x8x8xf32>
    %153 = tpu.matmul %152, %136, %cst_45 {dimension_numbers = #tpu.dot_dimension_numbers<[2], [1], [1], [2], [0, 0, 0, 1, 1, 2], [0], [0]>} : vector<2x8x8xf32>, vector<2x8x8xf32>, vector<2x8x8xf32> -> vector<2x8x8xf32>
    "tpu.trace_stop"() : () -> ()
    %154 = vector.shape_cast %153 : vector<2x8x8xf32> to vector<16x8xf32>
    %155 = vector.extract_strided_slice %60 {offsets = [24, 0], sizes = [8, 32], strides = [1, 1]} : vector<32x32xf32> to vector<8x32xf32>
    %cst_46 = arith.constant dense<0.000000e+00> : vector<16x32xf32>
    %156 = tpu.matmul %154, %155, %cst_46 {dimension_numbers = #tpu.dot_dimension_numbers<[1], [0], [0], [1], [0, 0, 1, 1], [], []>} : vector<16x8xf32>, vector<8x32xf32>, vector<16x32xf32> -> vector<16x32xf32>
    %157 = arith.addf %133, %156 : vector<16x32xf32>
    %158 = arith.addf %14, %157 : vector<16x32xf32>
    %159 = vector.broadcast %26 : vector<1x32xf32> to vector<16x32xf32>
    %160 = arith.addf %158, %159 : vector<16x32xf32>
    %cst_47 = arith.constant dense<0.000000e+00> : vector<16xf32>
    %161 = vector.multi_reduction <add>, %160, %cst_47 [1] : vector<16x32xf32> to vector<16xf32>
    %162 = vector.shape_cast %161 : vector<16xf32> to vector<16x1xf32>
    %cst_48 = arith.constant 3.200000e+01 : f32
    %163 = vector.broadcast %cst_48 : f32 to vector<16x1xf32>
    %164 = arith.divf %162, %163 : vector<16x1xf32>
    %165 = arith.mulf %160, %160 : vector<16x32xf32>
    %cst_49 = arith.constant dense<0.000000e+00> : vector<16xf32>
    %166 = vector.multi_reduction <add>, %165, %cst_49 [1] : vector<16x32xf32> to vector<16xf32>
    %167 = vector.shape_cast %166 : vector<16xf32> to vector<16x1xf32>
    %cst_50 = arith.constant 3.200000e+01 : f32
    %168 = vector.broadcast %cst_50 : f32 to vector<16x1xf32>
    %169 = arith.divf %167, %168 : vector<16x1xf32>
    %170 = arith.mulf %164, %164 : vector<16x1xf32>
    %171 = arith.subf %169, %170 : vector<16x1xf32>
    %172 = vector.broadcast %164 : vector<16x1xf32> to vector<16x32xf32>
    %173 = arith.subf %160, %172 : vector<16x32xf32>
    %cst_51 = arith.constant 9.99999974E-6 : f32
    %174 = vector.broadcast %cst_51 : f32 to vector<16x1xf32>
    %175 = arith.addf %171, %174 : vector<16x1xf32>
    %176 = math.rsqrt %175 : vector<16x1xf32>
    %177 = vector.broadcast %176 : vector<16x1xf32> to vector<16x32xf32>
    %178 = arith.mulf %173, %177 : vector<16x32xf32>
    %179 = vector.broadcast %27 : vector<1x32xf32> to vector<16x32xf32>
    %180 = arith.mulf %178, %179 : vector<16x32xf32>
    %181 = vector.broadcast %28 : vector<1x32xf32> to vector<16x32xf32>
    %182 = arith.addf %180, %181 : vector<16x32xf32>
    %c0_52 = arith.constant 0 : index
    %c0_53 = arith.constant 0 : index
    %c0_54 = arith.constant 0 : index
    %183 = vector.load %arg4[%c0_52, %c0_53, %c0_54] : memref<2x32x128xf32, #tpu.memory_space<vmem>>, vector<1x32x128xf32>
    %184 = vector.shape_cast %183 : vector<1x32x128xf32> to vector<32x128xf32>
    %cst_55 = arith.constant dense<0.000000e+00> : vector<16x128xf32>
    %185 = tpu.matmul %182, %184, %cst_55 {dimension_numbers = #tpu.dot_dimension_numbers<[1], [0], [0], [1], [0, 0, 1, 1], [], []>} : vector<16x32xf32>, vector<32x128xf32>, vector<16x128xf32> -> vector<16x128xf32>
    %186 = vector.broadcast %29 : vector<1x128xf32> to vector<16x128xf32>
    %187 = arith.addf %185, %186 : vector<16x128xf32>
    %cst_56 = arith.constant 5.000000e-01 : f32
    %188 = vector.broadcast %cst_56 : f32 to vector<16x128xf32>
    %189 = arith.mulf %188, %187 : vector<16x128xf32>
    %cst_57 = arith.constant 4.471500e-02 : f32
    %190 = vector.broadcast %cst_57 : f32 to vector<16x128xf32>
    %191 = arith.mulf %190, %187 : vector<16x128xf32>
    %192 = arith.mulf %191, %187 : vector<16x128xf32>
    %193 = arith.mulf %192, %187 : vector<16x128xf32>
    %194 = arith.addf %187, %193 : vector<16x128xf32>
    %cst_58 = arith.constant 0.797884583 : f32
    %195 = vector.broadcast %cst_58 : f32 to vector<16x128xf32>
    %196 = arith.mulf %195, %194 : vector<16x128xf32>
    %197 = math.tanh %196 : vector<16x128xf32>
    %cst_59 = arith.constant 1.000000e+00 : f32
    %198 = vector.broadcast %cst_59 : f32 to vector<16x128xf32>
    %199 = arith.addf %198, %197 : vector<16x128xf32>
    %200 = arith.mulf %189, %199 : vector<16x128xf32>
    %c0_60 = arith.constant 0 : index
    %c0_61 = arith.constant 0 : index
    %c0_62 = arith.constant 0 : index
    %201 = vector.load %arg5[%c0_60, %c0_61, %c0_62] : memref<2x128x32xf32, #tpu.memory_space<vmem>>, vector<1x128x32xf32>
    %202 = vector.shape_cast %201 : vector<1x128x32xf32> to vector<128x32xf32>
    %cst_63 = arith.constant dense<0.000000e+00> : vector<16x32xf32>
    %203 = tpu.matmul %200, %202, %cst_63 {dimension_numbers = #tpu.dot_dimension_numbers<[1], [0], [0], [1], [0, 0, 1, 1], [], []>} : vector<16x128xf32>, vector<128x32xf32>, vector<16x32xf32> -> vector<16x32xf32>
    %204 = vector.broadcast %30 : vector<1x32xf32> to vector<16x32xf32>
    %205 = arith.addf %203, %204 : vector<16x32xf32>
    %206 = arith.addf %160, %205 : vector<16x32xf32>
    %c1 = arith.constant 1 : index
    %c0_64 = arith.constant 0 : index
    %c0_65 = arith.constant 0 : index
    %207 = vector.load %arg1[%c1, %c0_64, %c0_65] : memref<2x8x128xf32, #tpu.memory_space<vmem>>, vector<1x8x128xf32>
    %208 = vector.shape_cast %207 : vector<1x8x128xf32> to vector<8x128xf32>
    %209 = vector.extract_strided_slice %208 {offsets = [0, 0], sizes = [1, 32], strides = [1, 1]} : vector<8x128xf32> to vector<1x32xf32>
    %210 = vector.extract_strided_slice %208 {offsets = [1, 0], sizes = [1, 32], strides = [1, 1]} : vector<8x128xf32> to vector<1x32xf32>
    %211 = vector.extract_strided_slice %208 {offsets = [2, 0], sizes = [1, 96], strides = [1, 1]} : vector<8x128xf32> to vector<1x96xf32>
    %212 = vector.extract_strided_slice %208 {offsets = [3, 0], sizes = [1, 32], strides = [1, 1]} : vector<8x128xf32> to vector<1x32xf32>
    %213 = vector.extract_strided_slice %208 {offsets = [4, 0], sizes = [1, 32], strides = [1, 1]} : vector<8x128xf32> to vector<1x32xf32>
    %214 = vector.extract_strided_slice %208 {offsets = [5, 0], sizes = [1, 32], strides = [1, 1]} : vector<8x128xf32> to vector<1x32xf32>
    %215 = vector.extract_strided_slice %208 {offsets = [6, 0], sizes = [1, 128], strides = [1, 1]} : vector<8x128xf32> to vector<1x128xf32>
    %216 = vector.extract_strided_slice %208 {offsets = [7, 0], sizes = [1, 32], strides = [1, 1]} : vector<8x128xf32> to vector<1x32xf32>
    %cst_66 = arith.constant dense<0.000000e+00> : vector<16xf32>
    %217 = vector.multi_reduction <add>, %206, %cst_66 [1] : vector<16x32xf32> to vector<16xf32>
    %218 = vector.shape_cast %217 : vector<16xf32> to vector<16x1xf32>
    %cst_67 = arith.constant 3.200000e+01 : f32
    %219 = vector.broadcast %cst_67 : f32 to vector<16x1xf32>
    %220 = arith.divf %218, %219 : vector<16x1xf32>
    %221 = arith.mulf %206, %206 : vector<16x32xf32>
    %cst_68 = arith.constant dense<0.000000e+00> : vector<16xf32>
    %222 = vector.multi_reduction <add>, %221, %cst_68 [1] : vector<16x32xf32> to vector<16xf32>
    %223 = vector.shape_cast %222 : vector<16xf32> to vector<16x1xf32>
    %cst_69 = arith.constant 3.200000e+01 : f32
    %224 = vector.broadcast %cst_69 : f32 to vector<16x1xf32>
    %225 = arith.divf %223, %224 : vector<16x1xf32>
    %226 = arith.mulf %220, %220 : vector<16x1xf32>
    %227 = arith.subf %225, %226 : vector<16x1xf32>
    %228 = vector.broadcast %220 : vector<16x1xf32> to vector<16x32xf32>
    %229 = arith.subf %206, %228 : vector<16x32xf32>
    %cst_70 = arith.constant 9.99999974E-6 : f32
    %230 = vector.broadcast %cst_70 : f32 to vector<16x1xf32>
    %231 = arith.addf %227, %230 : vector<16x1xf32>
    %232 = math.rsqrt %231 : vector<16x1xf32>
    %233 = vector.broadcast %232 : vector<16x1xf32> to vector<16x32xf32>
    %234 = arith.mulf %229, %233 : vector<16x32xf32>
    %235 = vector.broadcast %209 : vector<1x32xf32> to vector<16x32xf32>
    %236 = arith.mulf %234, %235 : vector<16x32xf32>
    %237 = vector.broadcast %210 : vector<1x32xf32> to vector<16x32xf32>
    %238 = arith.addf %236, %237 : vector<16x32xf32>
    %c1_71 = arith.constant 1 : index
    %c0_72 = arith.constant 0 : index
    %c0_73 = arith.constant 0 : index
    %239 = vector.load %arg2[%c1_71, %c0_72, %c0_73] : memref<2x32x96xf32, #tpu.memory_space<vmem>>, vector<1x32x96xf32>
    %240 = vector.shape_cast %239 : vector<1x32x96xf32> to vector<32x96xf32>
    %cst_74 = arith.constant dense<0.000000e+00> : vector<16x96xf32>
    %241 = tpu.matmul %238, %240, %cst_74 {dimension_numbers = #tpu.dot_dimension_numbers<[1], [0], [0], [1], [0, 0, 1, 1], [], []>} : vector<16x32xf32>, vector<32x96xf32>, vector<16x96xf32> -> vector<16x96xf32>
    %242 = vector.broadcast %211 : vector<1x96xf32> to vector<16x96xf32>
    %243 = arith.addf %241, %242 : vector<16x96xf32>
    %244 = vector.shape_cast %243 : vector<16x96xf32> to vector<2x8x96xf32>
    %c1_75 = arith.constant 1 : index
    %c0_76 = arith.constant 0 : index
    %c0_77 = arith.constant 0 : index
    %245 = vector.load %arg3[%c1_75, %c0_76, %c0_77] : memref<2x32x32xf32, #tpu.memory_space<vmem>>, vector<1x32x32xf32>
    %246 = vector.shape_cast %245 : vector<1x32x32xf32> to vector<32x32xf32>
    %cst_78 = arith.constant 0.000000e+00 : f32
    %247 = vector.broadcast %cst_78 : f32 to vector<16x32xf32>
    %248 = vector.extract_strided_slice %244 {offsets = [0, 0, 0], sizes = [2, 8, 8], strides = [1, 1, 1]} : vector<2x8x96xf32> to vector<2x8x8xf32>
    %249 = vector.extract_strided_slice %244 {offsets = [0, 0, 32], sizes = [2, 8, 8], strides = [1, 1, 1]} : vector<2x8x96xf32> to vector<2x8x8xf32>
    %250 = vector.extract_strided_slice %244 {offsets = [0, 0, 64], sizes = [2, 8, 8], strides = [1, 1, 1]} : vector<2x8x96xf32> to vector<2x8x8xf32>
    "tpu.trace_start"() <{level = 10 : i32, message = "bqd,bkd->bqk"}> : () -> ()
    %cst_79 = arith.constant dense<0.000000e+00> : vector<2x8x8xf32>
    %251 = tpu.matmul %248, %249, %cst_79 {dimension_numbers = #tpu.dot_dimension_numbers<[2], [2], [1], [1], [0, 0, 0, 1, 1, 1], [0], [0]>} : vector<2x8x8xf32>, vector<2x8x8xf32>, vector<2x8x8xf32> -> vector<2x8x8xf32>
    "tpu.trace_stop"() : () -> ()
    %cst_80 = arith.constant 0.353553385 : f32
    %252 = vector.broadcast %cst_80 : f32 to vector<2x8x8xf32>
    %253 = arith.mulf %251, %252 : vector<2x8x8xf32>
    %254 = vector.shape_cast %20 : vector<8x8xf32> to vector<1x8x8xf32>
    %255 = vector.broadcast %254 : vector<1x8x8xf32> to vector<2x8x8xf32>
    %256 = arith.addf %253, %255 : vector<2x8x8xf32>
    %cst_81 = arith.constant dense<0xFF800000> : vector<2x8xf32>
    %257 = vector.multi_reduction <maximumf>, %256, %cst_81 [2] : vector<2x8x8xf32> to vector<2x8xf32>
    %258 = vector.shape_cast %257 : vector<2x8xf32> to vector<2x8x1xf32>
    %259 = vector.broadcast %258 : vector<2x8x1xf32> to vector<2x8x8xf32>
    %260 = arith.subf %256, %259 : vector<2x8x8xf32>
    %261 = math.exp %260 : vector<2x8x8xf32>
    %cst_82 = arith.constant dense<0.000000e+00> : vector<2x8xf32>
    %262 = vector.multi_reduction <add>, %261, %cst_82 [2] : vector<2x8x8xf32> to vector<2x8xf32>
    %263 = vector.shape_cast %262 : vector<2x8xf32> to vector<2x8x1xf32>
    %264 = tpu.reciprocal %263 {approx = true} : vector<2x8x1xf32> -> vector<2x8x1xf32>
    %265 = vector.broadcast %264 : vector<2x8x1xf32> to vector<2x8x8xf32>
    %266 = arith.mulf %261, %265 : vector<2x8x8xf32>
    "tpu.trace_start"() <{level = 10 : i32, message = "bqk,bkd->bqd"}> : () -> ()
    %cst_83 = arith.constant dense<0.000000e+00> : vector<2x8x8xf32>
    %267 = tpu.matmul %266, %250, %cst_83 {dimension_numbers = #tpu.dot_dimension_numbers<[2], [1], [1], [2], [0, 0, 0, 1, 1, 2], [0], [0]>} : vector<2x8x8xf32>, vector<2x8x8xf32>, vector<2x8x8xf32> -> vector<2x8x8xf32>
    "tpu.trace_stop"() : () -> ()
    %268 = vector.shape_cast %267 : vector<2x8x8xf32> to vector<16x8xf32>
    %269 = vector.extract_strided_slice %246 {offsets = [0, 0], sizes = [8, 32], strides = [1, 1]} : vector<32x32xf32> to vector<8x32xf32>
    %cst_84 = arith.constant dense<0.000000e+00> : vector<16x32xf32>
    %270 = tpu.matmul %268, %269, %cst_84 {dimension_numbers = #tpu.dot_dimension_numbers<[1], [0], [0], [1], [0, 0, 1, 1], [], []>} : vector<16x8xf32>, vector<8x32xf32>, vector<16x32xf32> -> vector<16x32xf32>
    %271 = arith.addf %247, %270 : vector<16x32xf32>
    %272 = vector.extract_strided_slice %244 {offsets = [0, 0, 8], sizes = [2, 8, 8], strides = [1, 1, 1]} : vector<2x8x96xf32> to vector<2x8x8xf32>
    %273 = vector.extract_strided_slice %244 {offsets = [0, 0, 40], sizes = [2, 8, 8], strides = [1, 1, 1]} : vector<2x8x96xf32> to vector<2x8x8xf32>
    %274 = vector.extract_strided_slice %244 {offsets = [0, 0, 72], sizes = [2, 8, 8], strides = [1, 1, 1]} : vector<2x8x96xf32> to vector<2x8x8xf32>
    "tpu.trace_start"() <{level = 10 : i32, message = "bqd,bkd->bqk"}> : () -> ()
    %cst_85 = arith.constant dense<0.000000e+00> : vector<2x8x8xf32>
    %275 = tpu.matmul %272, %273, %cst_85 {dimension_numbers = #tpu.dot_dimension_numbers<[2], [2], [1], [1], [0, 0, 0, 1, 1, 1], [0], [0]>} : vector<2x8x8xf32>, vector<2x8x8xf32>, vector<2x8x8xf32> -> vector<2x8x8xf32>
    "tpu.trace_stop"() : () -> ()
    %cst_86 = arith.constant 0.353553385 : f32
    %276 = vector.broadcast %cst_86 : f32 to vector<2x8x8xf32>
    %277 = arith.mulf %275, %276 : vector<2x8x8xf32>
    %278 = vector.shape_cast %20 : vector<8x8xf32> to vector<1x8x8xf32>
    %279 = vector.broadcast %278 : vector<1x8x8xf32> to vector<2x8x8xf32>
    %280 = arith.addf %277, %279 : vector<2x8x8xf32>
    %cst_87 = arith.constant dense<0xFF800000> : vector<2x8xf32>
    %281 = vector.multi_reduction <maximumf>, %280, %cst_87 [2] : vector<2x8x8xf32> to vector<2x8xf32>
    %282 = vector.shape_cast %281 : vector<2x8xf32> to vector<2x8x1xf32>
    %283 = vector.broadcast %282 : vector<2x8x1xf32> to vector<2x8x8xf32>
    %284 = arith.subf %280, %283 : vector<2x8x8xf32>
    %285 = math.exp %284 : vector<2x8x8xf32>
    %cst_88 = arith.constant dense<0.000000e+00> : vector<2x8xf32>
    %286 = vector.multi_reduction <add>, %285, %cst_88 [2] : vector<2x8x8xf32> to vector<2x8xf32>
    %287 = vector.shape_cast %286 : vector<2x8xf32> to vector<2x8x1xf32>
    %288 = tpu.reciprocal %287 {approx = true} : vector<2x8x1xf32> -> vector<2x8x1xf32>
    %289 = vector.broadcast %288 : vector<2x8x1xf32> to vector<2x8x8xf32>
    %290 = arith.mulf %285, %289 : vector<2x8x8xf32>
    "tpu.trace_start"() <{level = 10 : i32, message = "bqk,bkd->bqd"}> : () -> ()
    %cst_89 = arith.constant dense<0.000000e+00> : vector<2x8x8xf32>
    %291 = tpu.matmul %290, %274, %cst_89 {dimension_numbers = #tpu.dot_dimension_numbers<[2], [1], [1], [2], [0, 0, 0, 1, 1, 2], [0], [0]>} : vector<2x8x8xf32>, vector<2x8x8xf32>, vector<2x8x8xf32> -> vector<2x8x8xf32>
    "tpu.trace_stop"() : () -> ()
    %292 = vector.shape_cast %291 : vector<2x8x8xf32> to vector<16x8xf32>
    %293 = vector.extract_strided_slice %246 {offsets = [8, 0], sizes = [8, 32], strides = [1, 1]} : vector<32x32xf32> to vector<8x32xf32>
    %cst_90 = arith.constant dense<0.000000e+00> : vector<16x32xf32>
    %294 = tpu.matmul %292, %293, %cst_90 {dimension_numbers = #tpu.dot_dimension_numbers<[1], [0], [0], [1], [0, 0, 1, 1], [], []>} : vector<16x8xf32>, vector<8x32xf32>, vector<16x32xf32> -> vector<16x32xf32>
    %295 = arith.addf %271, %294 : vector<16x32xf32>
    %296 = vector.extract_strided_slice %244 {offsets = [0, 0, 16], sizes = [2, 8, 8], strides = [1, 1, 1]} : vector<2x8x96xf32> to vector<2x8x8xf32>
    %297 = vector.extract_strided_slice %244 {offsets = [0, 0, 48], sizes = [2, 8, 8], strides = [1, 1, 1]} : vector<2x8x96xf32> to vector<2x8x8xf32>
    %298 = vector.extract_strided_slice %244 {offsets = [0, 0, 80], sizes = [2, 8, 8], strides = [1, 1, 1]} : vector<2x8x96xf32> to vector<2x8x8xf32>
    "tpu.trace_start"() <{level = 10 : i32, message = "bqd,bkd->bqk"}> : () -> ()
    %cst_91 = arith.constant dense<0.000000e+00> : vector<2x8x8xf32>
    %299 = tpu.matmul %296, %297, %cst_91 {dimension_numbers = #tpu.dot_dimension_numbers<[2], [2], [1], [1], [0, 0, 0, 1, 1, 1], [0], [0]>} : vector<2x8x8xf32>, vector<2x8x8xf32>, vector<2x8x8xf32> -> vector<2x8x8xf32>
    "tpu.trace_stop"() : () -> ()
    %cst_92 = arith.constant 0.353553385 : f32
    %300 = vector.broadcast %cst_92 : f32 to vector<2x8x8xf32>
    %301 = arith.mulf %299, %300 : vector<2x8x8xf32>
    %302 = vector.shape_cast %20 : vector<8x8xf32> to vector<1x8x8xf32>
    %303 = vector.broadcast %302 : vector<1x8x8xf32> to vector<2x8x8xf32>
    %304 = arith.addf %301, %303 : vector<2x8x8xf32>
    %cst_93 = arith.constant dense<0xFF800000> : vector<2x8xf32>
    %305 = vector.multi_reduction <maximumf>, %304, %cst_93 [2] : vector<2x8x8xf32> to vector<2x8xf32>
    %306 = vector.shape_cast %305 : vector<2x8xf32> to vector<2x8x1xf32>
    %307 = vector.broadcast %306 : vector<2x8x1xf32> to vector<2x8x8xf32>
    %308 = arith.subf %304, %307 : vector<2x8x8xf32>
    %309 = math.exp %308 : vector<2x8x8xf32>
    %cst_94 = arith.constant dense<0.000000e+00> : vector<2x8xf32>
    %310 = vector.multi_reduction <add>, %309, %cst_94 [2] : vector<2x8x8xf32> to vector<2x8xf32>
    %311 = vector.shape_cast %310 : vector<2x8xf32> to vector<2x8x1xf32>
    %312 = tpu.reciprocal %311 {approx = true} : vector<2x8x1xf32> -> vector<2x8x1xf32>
    %313 = vector.broadcast %312 : vector<2x8x1xf32> to vector<2x8x8xf32>
    %314 = arith.mulf %309, %313 : vector<2x8x8xf32>
    "tpu.trace_start"() <{level = 10 : i32, message = "bqk,bkd->bqd"}> : () -> ()
    %cst_95 = arith.constant dense<0.000000e+00> : vector<2x8x8xf32>
    %315 = tpu.matmul %314, %298, %cst_95 {dimension_numbers = #tpu.dot_dimension_numbers<[2], [1], [1], [2], [0, 0, 0, 1, 1, 2], [0], [0]>} : vector<2x8x8xf32>, vector<2x8x8xf32>, vector<2x8x8xf32> -> vector<2x8x8xf32>
    "tpu.trace_stop"() : () -> ()
    %316 = vector.shape_cast %315 : vector<2x8x8xf32> to vector<16x8xf32>
    %317 = vector.extract_strided_slice %246 {offsets = [16, 0], sizes = [8, 32], strides = [1, 1]} : vector<32x32xf32> to vector<8x32xf32>
    %cst_96 = arith.constant dense<0.000000e+00> : vector<16x32xf32>
    %318 = tpu.matmul %316, %317, %cst_96 {dimension_numbers = #tpu.dot_dimension_numbers<[1], [0], [0], [1], [0, 0, 1, 1], [], []>} : vector<16x8xf32>, vector<8x32xf32>, vector<16x32xf32> -> vector<16x32xf32>
    %319 = arith.addf %295, %318 : vector<16x32xf32>
    %320 = vector.extract_strided_slice %244 {offsets = [0, 0, 24], sizes = [2, 8, 8], strides = [1, 1, 1]} : vector<2x8x96xf32> to vector<2x8x8xf32>
    %321 = vector.extract_strided_slice %244 {offsets = [0, 0, 56], sizes = [2, 8, 8], strides = [1, 1, 1]} : vector<2x8x96xf32> to vector<2x8x8xf32>
    %322 = vector.extract_strided_slice %244 {offsets = [0, 0, 88], sizes = [2, 8, 8], strides = [1, 1, 1]} : vector<2x8x96xf32> to vector<2x8x8xf32>
    "tpu.trace_start"() <{level = 10 : i32, message = "bqd,bkd->bqk"}> : () -> ()
    %cst_97 = arith.constant dense<0.000000e+00> : vector<2x8x8xf32>
    %323 = tpu.matmul %320, %321, %cst_97 {dimension_numbers = #tpu.dot_dimension_numbers<[2], [2], [1], [1], [0, 0, 0, 1, 1, 1], [0], [0]>} : vector<2x8x8xf32>, vector<2x8x8xf32>, vector<2x8x8xf32> -> vector<2x8x8xf32>
    "tpu.trace_stop"() : () -> ()
    %cst_98 = arith.constant 0.353553385 : f32
    %324 = vector.broadcast %cst_98 : f32 to vector<2x8x8xf32>
    %325 = arith.mulf %323, %324 : vector<2x8x8xf32>
    %326 = vector.shape_cast %20 : vector<8x8xf32> to vector<1x8x8xf32>
    %327 = vector.broadcast %326 : vector<1x8x8xf32> to vector<2x8x8xf32>
    %328 = arith.addf %325, %327 : vector<2x8x8xf32>
    %cst_99 = arith.constant dense<0xFF800000> : vector<2x8xf32>
    %329 = vector.multi_reduction <maximumf>, %328, %cst_99 [2] : vector<2x8x8xf32> to vector<2x8xf32>
    %330 = vector.shape_cast %329 : vector<2x8xf32> to vector<2x8x1xf32>
    %331 = vector.broadcast %330 : vector<2x8x1xf32> to vector<2x8x8xf32>
    %332 = arith.subf %328, %331 : vector<2x8x8xf32>
    %333 = math.exp %332 : vector<2x8x8xf32>
    %cst_100 = arith.constant dense<0.000000e+00> : vector<2x8xf32>
    %334 = vector.multi_reduction <add>, %333, %cst_100 [2] : vector<2x8x8xf32> to vector<2x8xf32>
    %335 = vector.shape_cast %334 : vector<2x8xf32> to vector<2x8x1xf32>
    %336 = tpu.reciprocal %335 {approx = true} : vector<2x8x1xf32> -> vector<2x8x1xf32>
    %337 = vector.broadcast %336 : vector<2x8x1xf32> to vector<2x8x8xf32>
    %338 = arith.mulf %333, %337 : vector<2x8x8xf32>
    "tpu.trace_start"() <{level = 10 : i32, message = "bqk,bkd->bqd"}> : () -> ()
    %cst_101 = arith.constant dense<0.000000e+00> : vector<2x8x8xf32>
    %339 = tpu.matmul %338, %322, %cst_101 {dimension_numbers = #tpu.dot_dimension_numbers<[2], [1], [1], [2], [0, 0, 0, 1, 1, 2], [0], [0]>} : vector<2x8x8xf32>, vector<2x8x8xf32>, vector<2x8x8xf32> -> vector<2x8x8xf32>
    "tpu.trace_stop"() : () -> ()
    %340 = vector.shape_cast %339 : vector<2x8x8xf32> to vector<16x8xf32>
    %341 = vector.extract_strided_slice %246 {offsets = [24, 0], sizes = [8, 32], strides = [1, 1]} : vector<32x32xf32> to vector<8x32xf32>
    %cst_102 = arith.constant dense<0.000000e+00> : vector<16x32xf32>
    %342 = tpu.matmul %340, %341, %cst_102 {dimension_numbers = #tpu.dot_dimension_numbers<[1], [0], [0], [1], [0, 0, 1, 1], [], []>} : vector<16x8xf32>, vector<8x32xf32>, vector<16x32xf32> -> vector<16x32xf32>
    %343 = arith.addf %319, %342 : vector<16x32xf32>
    %344 = arith.addf %206, %343 : vector<16x32xf32>
    %345 = vector.broadcast %212 : vector<1x32xf32> to vector<16x32xf32>
    %346 = arith.addf %344, %345 : vector<16x32xf32>
    %cst_103 = arith.constant dense<0.000000e+00> : vector<16xf32>
    %347 = vector.multi_reduction <add>, %346, %cst_103 [1] : vector<16x32xf32> to vector<16xf32>
    %348 = vector.shape_cast %347 : vector<16xf32> to vector<16x1xf32>
    %cst_104 = arith.constant 3.200000e+01 : f32
    %349 = vector.broadcast %cst_104 : f32 to vector<16x1xf32>
    %350 = arith.divf %348, %349 : vector<16x1xf32>
    %351 = arith.mulf %346, %346 : vector<16x32xf32>
    %cst_105 = arith.constant dense<0.000000e+00> : vector<16xf32>
    %352 = vector.multi_reduction <add>, %351, %cst_105 [1] : vector<16x32xf32> to vector<16xf32>
    %353 = vector.shape_cast %352 : vector<16xf32> to vector<16x1xf32>
    %cst_106 = arith.constant 3.200000e+01 : f32
    %354 = vector.broadcast %cst_106 : f32 to vector<16x1xf32>
    %355 = arith.divf %353, %354 : vector<16x1xf32>
    %356 = arith.mulf %350, %350 : vector<16x1xf32>
    %357 = arith.subf %355, %356 : vector<16x1xf32>
    %358 = vector.broadcast %350 : vector<16x1xf32> to vector<16x32xf32>
    %359 = arith.subf %346, %358 : vector<16x32xf32>
    %cst_107 = arith.constant 9.99999974E-6 : f32
    %360 = vector.broadcast %cst_107 : f32 to vector<16x1xf32>
    %361 = arith.addf %357, %360 : vector<16x1xf32>
    %362 = math.rsqrt %361 : vector<16x1xf32>
    %363 = vector.broadcast %362 : vector<16x1xf32> to vector<16x32xf32>
    %364 = arith.mulf %359, %363 : vector<16x32xf32>
    %365 = vector.broadcast %213 : vector<1x32xf32> to vector<16x32xf32>
    %366 = arith.mulf %364, %365 : vector<16x32xf32>
    %367 = vector.broadcast %214 : vector<1x32xf32> to vector<16x32xf32>
    %368 = arith.addf %366, %367 : vector<16x32xf32>
    %c1_108 = arith.constant 1 : index
    %c0_109 = arith.constant 0 : index
    %c0_110 = arith.constant 0 : index
    %369 = vector.load %arg4[%c1_108, %c0_109, %c0_110] : memref<2x32x128xf32, #tpu.memory_space<vmem>>, vector<1x32x128xf32>
    %370 = vector.shape_cast %369 : vector<1x32x128xf32> to vector<32x128xf32>
    %cst_111 = arith.constant dense<0.000000e+00> : vector<16x128xf32>
    %371 = tpu.matmul %368, %370, %cst_111 {dimension_numbers = #tpu.dot_dimension_numbers<[1], [0], [0], [1], [0, 0, 1, 1], [], []>} : vector<16x32xf32>, vector<32x128xf32>, vector<16x128xf32> -> vector<16x128xf32>
    %372 = vector.broadcast %215 : vector<1x128xf32> to vector<16x128xf32>
    %373 = arith.addf %371, %372 : vector<16x128xf32>
    %cst_112 = arith.constant 5.000000e-01 : f32
    %374 = vector.broadcast %cst_112 : f32 to vector<16x128xf32>
    %375 = arith.mulf %374, %373 : vector<16x128xf32>
    %cst_113 = arith.constant 4.471500e-02 : f32
    %376 = vector.broadcast %cst_113 : f32 to vector<16x128xf32>
    %377 = arith.mulf %376, %373 : vector<16x128xf32>
    %378 = arith.mulf %377, %373 : vector<16x128xf32>
    %379 = arith.mulf %378, %373 : vector<16x128xf32>
    %380 = arith.addf %373, %379 : vector<16x128xf32>
    %cst_114 = arith.constant 0.797884583 : f32
    %381 = vector.broadcast %cst_114 : f32 to vector<16x128xf32>
    %382 = arith.mulf %381, %380 : vector<16x128xf32>
    %383 = math.tanh %382 : vector<16x128xf32>
    %cst_115 = arith.constant 1.000000e+00 : f32
    %384 = vector.broadcast %cst_115 : f32 to vector<16x128xf32>
    %385 = arith.addf %384, %383 : vector<16x128xf32>
    %386 = arith.mulf %375, %385 : vector<16x128xf32>
    %c1_116 = arith.constant 1 : index
    %c0_117 = arith.constant 0 : index
    %c0_118 = arith.constant 0 : index
    %387 = vector.load %arg5[%c1_116, %c0_117, %c0_118] : memref<2x128x32xf32, #tpu.memory_space<vmem>>, vector<1x128x32xf32>
    %388 = vector.shape_cast %387 : vector<1x128x32xf32> to vector<128x32xf32>
    %cst_119 = arith.constant dense<0.000000e+00> : vector<16x32xf32>
    %389 = tpu.matmul %386, %388, %cst_119 {dimension_numbers = #tpu.dot_dimension_numbers<[1], [0], [0], [1], [0, 0, 1, 1], [], []>} : vector<16x128xf32>, vector<128x32xf32>, vector<16x32xf32> -> vector<16x32xf32>
    %390 = vector.broadcast %216 : vector<1x32xf32> to vector<16x32xf32>
    %391 = arith.addf %389, %390 : vector<16x32xf32>
    %392 = arith.addf %346, %391 : vector<16x32xf32>
    %c0_120 = arith.constant 0 : index
    %c0_121 = arith.constant 0 : index
    %393 = vector.load %arg7[%c0_120, %c0_121] : memref<32x256xf32, #tpu.memory_space<vmem>>, vector<32x256xf32>
    %cst_122 = arith.constant dense<0.000000e+00> : vector<16x256xf32>
    %394 = tpu.matmul %392, %393, %cst_122 {dimension_numbers = #tpu.dot_dimension_numbers<[1], [0], [0], [1], [0, 0, 1, 1], [], []>} : vector<16x32xf32>, vector<32x256xf32>, vector<16x256xf32> -> vector<16x256xf32>
    %c0_123 = arith.constant 0 : index
    %c0_124 = arith.constant 0 : index
    %395 = vector.load %arg9[%c0_123, %c0_124] : memref<1x256xf32, #tpu.memory_space<vmem>>, vector<1x256xf32>
    %396 = vector.broadcast %395 : vector<1x256xf32> to vector<16x256xf32>
    %397 = arith.addf %394, %396 : vector<16x256xf32>
    %c0_125 = arith.constant 0 : index
    %c0_126 = arith.constant 0 : index
    %398 = vector.load %arg10[%c0_125, %c0_126] : memref<16x256xf32, #tpu.memory_space<vmem>>, vector<16x256xf32>
    tpu.vector_store %arg10[%c0_125, %c0_126], %397 {strides = array<i32>} : memref<16x256xf32, #tpu.memory_space<vmem>>, vector<16x256xf32>,
    return
  }
}

</mosaic_0001>

<bundles_post_ra>
// kernel: gpt2_forward.1
= control target key start
LH: loop header
LB: loop body
LE: loop exit
PB: predicated region body
PF: predicated region fallthrough
CT: control target
= control target key end

     0   :  { %v2250_v0 = vmov 0   ;;  %v37_v33 = vlaneseq  ;;  %v2251_v40 = vmov 1.0   ;;  %vm144_vm5 = vcmask 261120   ;;  %s2253_s28 = smov 96   ;;  %s2254_s29 = smov 88   ;;  %s3004_s0 = inlined_call_operand.vmem [shape: s32[16,1], index: 0, kind: input, shape index: {}]   ;;  %s3005_s6 = inlined_call_operand.vmem [shape: f32[256,32], index: 6, kind: input, shape index: {}]   ;;  %s3006_s8 = inlined_call_operand.vmem [shape: f32[16,32], index: 8, kind: input, shape index: {}]   ;;  %s3007_s2 = inlined_call_operand.vmem [shape: f32[2,32,96], index: 2, kind: input, shape index: {}]   ;;  %s3008_s1 = inlined_call_operand.vmem [shape: f32[2,8,128], index: 1, kind: input, shape index: {}]   ;;  %s3009_s3 = inlined_call_operand.vmem [shape: f32[2,32,32], index: 3, kind: input, shape index: {}]   ;;  %s3010_s4 = inlined_call_operand.vmem [shape: f32[2,32,128], index: 4, kind: input, shape index: {}]   ;;  %s3011_s5 = inlined_call_operand.vmem [shape: f32[2,128,32], index: 5, kind: input, shape index: {}]   ;;  %s3012_s7 = inlined_call_operand.vmem [shape: f32[32,256], index: 7, kind: input, shape index: {}]   ;;  %s3013_s9 = inlined_call_operand.vmem [shape: f32[1,256], index: 9, kind: input, shape index: {}]   ;;  %s3014_s10 = inlined_call_operand.vmem [shape: f32[16,256], index: 10, kind: output, shape index: {}]  }
   0x1   :  { %2159 = vset.pattern.permute.xlu0 %v2250_v0  ;;  %v35_v1 = vld [vmem:[%s3004_s0] sm:$0xff]  ;;  %v73_v2 = vld [vmem:[%s3005_s6 + $0x78] sm:$0xff]  ;;  %v72_v4 = vld [vmem:[%s3005_s6 + $0x70] sm:$0xff]  ;;  %v2252_v57 = vmov 32.0   ;;  %s2255_s30 = smov 80   ;;  %vm247_vm13 = vcmask 64512  }
   0x2   :  { %41 = vperm.xlu0 %2159, %v35_v1   ;;  %90 = vmatpush.msra.mxu0 %v73_v2  ;;  %v89_v3 = vld [vmem:[%s3005_s6 + $0xf8] sm:$0xff]  ;;  %v88_v5 = vld [vmem:[%s3005_s6 + $0xf0] sm:$0xff]  ;;  %v71_v6 = vld [vmem:[%s3005_s6 + $0x68] sm:$0xff]  ;;  %v2422_v36 = vand.u32 127, %v37_v33  ;;  %v2424_v37 = vshrl.u32 %v37_v33, 7  ;;  %2160 = vrcp.f32 %v2252_v57  ;;  %s2257_s11 = smov 64  }
   0x3   :  { %113 = vmatpush.msra.mxu1 %v89_v3  ;;  %v87_v7 = vld [vmem:[%s3005_s6 + $0xe8] sm:$0xff]  ;;  %v70_v8 = vld [vmem:[%s3005_s6 + $0x60] sm:$0xff]  ;;  %v69_v11 = vld [vmem:[%s3005_s6 + $0x58] sm:$0xff]  ;;  %s2258_s12 = smov 120   ;;  %s2259_s13 = smov 112  }
   0x4   :  { %91 = vmatpush.msra.mxu0 %v72_v4  ;;  %v86_v9 = vld [vmem:[%s3005_s6 + $0xe0] sm:$0xff]  ;;  %v36_v10 = vld [vmem:[%s3004_s0 + $0x8] sm:$0xff]  ;;  %v85_v12 = vld [vmem:[%s3005_s6 + $0xd8] sm:$0xff]  ;;  %vm141_vm0 = vcmp.le.s32.totalorder %v2422_v36, %v2424_v37  ;;  %v39_v38 = vadd.s32 128, %v2422_v36  ;;  %s2260_s14 = smov 104   ;;  %s2261_s15 = smov 72  }
   0x5   :  { %114 = vmatpush.msra.mxu1 %v88_v5  ;;  %v68_v13 = vld [vmem:[%s3005_s6 + $0x50] sm:$0xff]  ;;  %v67_v15 = vld [vmem:[%s3005_s6 + $0x48] sm:$0xff]  ;;  %v66_v17 = vld [vmem:[%s3005_s6 + $0x40] sm:$0xff]  ;;  %s2262_s18 = smov 56   ;;  %s2264_s19 = smov 40  }
   0x6   :  { %92 = vmatpush.msra.mxu0 %v71_v6  ;;  %v84_v14 = vld [vmem:[%s3005_s6 + $0xd0] sm:$0xff]  ;;  %v83_v16 = vld [vmem:[%s3005_s6 + $0xc8] sm:$0xff]  ;;  %v82_v18 = vld [vmem:[%s3005_s6 + $0xc0] sm:$0xff] }
   0x7   :  { %115 = vmatpush.msra.mxu1 %v87_v7  ;;  %v65_v19 = vld [vmem:[%s3005_s6 + $0x38] sm:$0xff]  ;;  %v64_v21 = vld [vmem:[%s3005_s6 + $0x30] sm:$0xff]  ;;  %v63_v23 = vld [vmem:[%s3005_s6 + $0x28] sm:$0xff] }
   0x8   :  { %93 = vmatpush.msra.mxu0 %v70_v8  ;;  %v81_v20 = vld [vmem:[%s3005_s6 + $0xb8] sm:$0xff]  ;;  %v80_v22 = vld [vmem:[%s3005_s6 + $0xb0] sm:$0xff]  ;;  %v79_v24 = vld [vmem:[%s3005_s6 + $0xa8] sm:$0xff]  ;;  %v2161_v58 = vpop.eup %2160 }
   0x9   :  { %116 = vmatpush.msra.mxu1 %v86_v9  ;;  %v62_v25 = vld [vmem:[%s3005_s6 + $0x20] sm:$0xff]  ;;  %v61_v27 = vld [vmem:[%s3005_s6 + $0x18] sm:$0xff]  ;;  %v60_v29 = vld [vmem:[%s3005_s6 + $0x10] sm:$0xff]  ;;  %v152_v59 = vmul.f32 32.0, %v2161_v58  ;;  %vm156_vm6 = vweird.f32 %v2161_v58 }
   0xa   :  { %44 = vperm.xlu0 %2159, %v36_v10   ;;  %94 = vmatpush.msra.mxu0 %v69_v11  ;;  %v78_v26 = vld [vmem:[%s3005_s6 + $0xa0] sm:$0xff]  ;;  %v77_v28 = vld [vmem:[%s3005_s6 + $0x98] sm:$0xff]  ;;  %v76_v30 = vld [vmem:[%s3005_s6 + $0x90] sm:$0xff] }
   0xb   :  { %117 = vmatpush.msra.mxu1 %v85_v12  ;;  %v59_v31 = vld [vmem:[%s3005_s6 + $0x8] sm:$0xff]  ;;  %v58_v34 = vld [vmem:[%s3005_s6] sm:$0xff]  ;;  %v153_v60 = vsub.f32 1.0, %v152_v59  ;;  %v209_v63 = vld [vmem:[%s3007_s2 + $0x18] sm:$0xff] }
   0xc   :  { %95 = vmatpush.msra.mxu0 %v68_v13  ;;  %v75_v32 = vld [vmem:[%s3005_s6 + $0x88] sm:$0xff]  ;;  %v74_v35 = vld [vmem:[%s3005_s6 + $0x80] sm:$0xff]  ;;  %229 = vmatpush.msra.mxu2 %v209_v63  ;;  %v208_v1 = vld [vmem:[%s3007_s2 + $0x10] sm:$0xff]  ;;  %s2263_s6 = smov 48  }
   0xd   :  { %118 = vmatpush.msra.mxu1 %v84_v14  ;;  %v136_v44 = vld [vmem:[%s3006_s8] sm:$0xff]  ;;  %v154_v61 = vmul.f32 %v2161_v58, %v153_v60  ;;  %v207_v3 = vld [vmem:[%s3007_s2 + $0x8] sm:$0xff] }
   0xe   :  { %96 = vmatpush.msra.mxu0 %v67_v15  ;;  %230 = vmatpush.msra.mxu2 %v208_v1  ;;  %v206_v5 = vld [vmem:[%s3007_s2] sm:$0xff] }
   0xf   :  { %119 = vmatpush.msra.mxu1 %v83_v16  ;;  %v155_v62 = vadd.f32 %v2161_v58, %v154_v61 }
  0x10   :  { %97 = vmatpush.msra.mxu0 %v66_v17  ;;  %231 = vmatpush.msra.mxu2 %v207_v3 }
  0x11   :  { %120 = vmatpush.msra.mxu1 %v82_v18  ;;  %v2454_v2 = vsel %vm156_vm6, %v2161_v58, %v155_v62 }
  0x12   :  { %98 = vmatpush.msra.mxu0 %v65_v19  ;;  %232 = vmatpush.msra.mxu2 %v206_v5 }
  0x13   :  { %121 = vmatpush.msra.mxu1 %v81_v20 }
  0x14   :  { %99 = vmatpush.msra.mxu0 %v64_v21 }
  0x15   :  { %122 = vmatpush.msra.mxu1 %v80_v22 }
  0x16   :  { %100 = vmatpush.msra.mxu0 %v63_v23  ;;  %v2469_v23 = vld [vmem:[%s3008_s1] sm:$0xff] }
  0x17   :  { %123 = vmatpush.msra.mxu1 %v79_v24 }
  0x18   :  { %101 = vmatpush.msra.mxu0 %v62_v25 }
  0x19   :  { %124 = vmatpush.msra.mxu1 %v78_v26 }
  0x1a   :  { %102 = vmatpush.msra.mxu0 %v61_v27 }
  0x1b   :  { %125 = vmatpush.msra.mxu1 %v77_v28  ;;  %v200_v28 = vperm.slane %v2469_v23, 0 }
  0x1c   :  { %103 = vmatpush.msra.mxu0 %v60_v29 }
  0x1d   :  { %126 = vmatpush.msra.mxu1 %v76_v30 }
  0x1e   :  { %104 = vmatpush.msra.mxu0 %v59_v31 }
  0x1f   :  { %127 = vmatpush.msra.mxu1 %v75_v32  ;;  %v203_v32 = vperm.slane %v2469_v23, 1 }
  0x20   :  { %105 = vmatpush.msra.mxu0 %v58_v34 }
  0x21   :  { %128 = vmatpush.msra.mxu1 %v74_v35 }
  0x74   :  { %v42_v39 = vpop.permute.xlu0 %41 }
  0x75   :  { %vm46_vm1 = vcmp.eq.s32.totalorder %v2422_v36, %v42_v39  ;;  %vm47_vm2 = vcmp.eq.s32.totalorder %v39_v38, %v42_v39 }
  0x76   :  { %2035 = vmatmul.msk.f32.vlgmr.msra.gmra.mxu0 %vm46_vm1, %v2251_v40  ;;  %2037 = vmatmul.msk.f32.vlgmr.msra.gmra.mxu1 %vm47_vm2, %v2251_v40 }
  0x7c   :  { %v45_v41 = vpop.permute.xlu0 %44 }
  0x7d   :  { %vm48_vm3 = vcmp.eq.s32.totalorder %v2422_v36, %v45_v41  ;;  %vm49_vm4 = vcmp.eq.s32.totalorder %v39_v38, %v45_v41 }
  0x7e   :  { %2036 = vmatmul.msk.f32.gmra.mxu0 %vm48_vm3, %v2251_v40  ;;  %2038 = vmatmul.msk.f32.gmra.mxu1 %vm49_vm4, %v2251_v40 }
  0xf3   :  { %v107_v42 = vpop.f32.mrf.mxu0  ;;  %v130_v43 = vpop.f32.mrf.mxu1 }
  0xf4   :  { %v131_v45 = vadd.f32 %v130_v43, %v107_v42 }
  0xf6   :  { %v2434_v46 = vadd.f32 %v136_v44, %v131_v45  ;;  %v210_v45 = vperm.slane %v2469_v23, 2 }
  0xf8   :  { %v145_v47 = vsel %vm144_vm5, %v2434_v46, 0.0  ;;  %v160_v51 = vmul.f32 %v2434_v46, %v2434_v46 }
  0xf9   :  { %146 = vadd.xlane.f32.xlu1 %v145_v47 }
  0xfa   :  { %v162_v53 = vsel %vm144_vm5, %v160_v51, 0.0 }
  0xfb   :  { %v110_v48 = vpop.f32.mrf.mxu0  ;;  %v133_v49 = vpop.f32.mrf.mxu1 }
  0xfc   :  { %v134_v50 = vadd.f32 %v133_v49, %v110_v48 }
  0xfe   :  { %v2440_v52 = vadd.f32 %v136_v44, %v134_v50 }
 0x100   :  { %v148_v54 = vsel %vm144_vm5, %v2440_v52, 0.0  ;;  %v161_v55 = vmul.f32 %v2440_v52, %v2440_v52 }
 0x101   :  { %163 = vadd.xlane.f32.xlu1 %v162_v53  ;;  %149 = vadd.xlane.f32.xlu2 %v148_v54 }
 0x102   :  { %v165_v56 = vsel %vm144_vm5, %v161_v55, 0.0 }
 0x109   :  { %166 = vadd.xlane.f32.xlu2 %v165_v56  ;;  %v2256_v56 = vmov -1e+30  }
 0x10a   :  { %v2500_v57 = vsel %vm141_vm0, 0.0, %v2256_v56 }
 0x16c   :  { %v147_v0 = vpop.xlane.xlu1 %146 }
 0x16d   :  { %v158_v4 = vmul.f32 %v2454_v2, %v147_v0 }
 0x16f   :  { %v170_v8 = vmul.f32 %v158_v4, %v158_v4  ;;  %v174_v27 = vsub.f32 %v2434_v46, %v158_v4 }
 0x174   :  { %v164_v6 = vpop.xlane.xlu1 %163  ;;  %v150_v7 = vpop.xlane.xlu2 %149 }
 0x175   :  { %v168_v9 = vmul.f32 %v164_v6, %v2454_v2  ;;  %v159_v12 = vmul.f32 %v2454_v2, %v150_v7 }
 0x177   :  { %v172_v10 = vsub.f32 %v168_v9, %v170_v8  ;;  %v171_v14 = vmul.f32 %v159_v12, %v159_v12  ;;  %v175_v40 = vsub.f32 %v2440_v52, %v159_v12 }
 0x179   :  { %v176_v11 = vadd.f32 1e-05, %v172_v10 }
 0x17b   :  { %2162 = vrsqrt.f32 %v176_v11  ;;  %vm184_vm8 = vweird.f32 %v176_v11 }
 0x17c   :  { %v167_v13 = vpop.xlane.xlu2 %166 }
 0x17d   :  { %v169_v15 = vmul.f32 %v167_v13, %v2454_v2 }
 0x17f   :  { %v173_v16 = vsub.f32 %v169_v15, %v171_v14 }
 0x181   :  { %v2163_v17 = vpop.eup %2162  ;;  %v177_v18 = vadd.f32 1e-05, %v173_v16 }
 0x182   :  { %v179_v19 = vmul.f32 %v2163_v17, %v176_v11  ;;  %vm185_vm7 = vweird.f32 %v2163_v17 }
 0x183   :  { %2164 = vrsqrt.f32 %v177_v18  ;;  %vm186_vm9 = vmor %vm184_vm8, %vm185_vm7  ;;  %vm194_vm11 = vweird.f32 %v177_v18 }
 0x184   :  { %v180_v20 = vmul.f32 %v2163_v17, %v179_v19 }
 0x186   :  { %v181_v21 = vmul.f32 0.5, %v180_v20 }
 0x188   :  { %v182_v22 = vsub.f32 1.5, %v181_v21 }
 0x189   :  { %v2165_v24 = vpop.eup %2164 }
 0x18a   :  { %v183_v25 = vmul.f32 %v2163_v17, %v182_v22  ;;  %v189_v26 = vmul.f32 %v2165_v24, %v177_v18  ;;  %vm195_vm10 = vweird.f32 %v2165_v24 }
 0x18b   :  { %vm196_vm12 = vmor %vm194_vm11, %vm195_vm10 }
 0x18c   :  { %v190_v29 = vmul.f32 %v2165_v24, %v189_v26  ;;  %v187_v30 = vsel %vm186_vm9, %v2163_v17, %v183_v25 }
 0x18d   :  { %v198_v31 = vmul.f32 %v187_v30, %v174_v27  ;;  %v240_v27 = vld [vmem:[%s3009_s3] sm:$0xff] }
 0x18e   :  { %v191_v33 = vmul.f32 0.5, %v190_v29  ;;  %561 = vmatpush.msrb.mxu0 %v240_v27 }
 0x18f   :  { %v201_v34 = vmul.f32 %v200_v28, %v198_v31 }
 0x190   :  { %v192_v35 = vsub.f32 1.5, %v191_v33 }
 0x191   :  { %v204_v38 = vadd.f32 %v203_v32, %v201_v34 }
 0x192   :  { %v193_v39 = vmul.f32 %v2165_v24, %v192_v35 }
 0x193   :  { %2039 = vmatmul.msk.f32.vlgmr.msra.gmra.mxu2 %vm144_vm5, %v204_v38 }
 0x194   :  { %v197_v41 = vsel %vm196_vm12, %v2165_v24, %v193_v39 }
 0x195   :  { %v199_v42 = vmul.f32 %v197_v41, %v175_v40 }
 0x197   :  { %v202_v43 = vmul.f32 %v200_v28, %v199_v42 }
 0x199   :  { %v205_v44 = vadd.f32 %v203_v32, %v202_v43 }
 0x19b   :  { %2040 = vmatmul.msk.f32.gmra.mxu2 %vm144_vm5, %v205_v44 }
 0x216   :  { %v234_v47 = vpop.f32.mrf.mxu2 }
 0x217   :  { %v2478_v48 = vadd.f32 %v234_v47, %v210_v45 }
 0x219   :  { %245 = vrot.lane.b32.xlu1 %v2478_v48, %s2253_s28 }
 0x21e   :  { %v237_v49 = vpop.f32.mrf.mxu2 }
 0x21f   :  { %v2482_v50 = vadd.f32 %v237_v49, %v210_v45 }
 0x221   :  { %407 = vrot.lane.b32.xlu1 %v2482_v50, %s2254_s29  ;;  %273 = vrot.lane.b32.xlu0 %v2482_v50, %s2253_s28 }
 0x229   :  { %571 = vrot.lane.b32.xlu1 %v2478_v48, %s2255_s30 }
 0x28b   :  { %v246_v51 = vpop.permute.xlu1 %245 }
 0x28c   :  { %2041 = vmatpush.xpose.msk.msrb.mxu2 %vm247_vm13, %v246_v51 }
 0x28f   :  { %2042 = vmatmul.msk.f32.vlgmr.msrb.gmra.mxu2 %vm247_vm13, %v2478_v48 }
 0x293   :  { %v408_v53 = vpop.permute.xlu1 %407  ;;  %v274_v54 = vpop.permute.xlu0 %273 }
 0x294   :  { %2043 = vmatpush.xpose.msk.msra.mxu3 %vm247_vm13, %v274_v54 }
 0x297   :  { %2044 = vmatmul.msk.f32.vlgmr.msra.gmra.mxu3 %vm247_vm13, %v2482_v50 }
 0x29b   :  { %v572_v55 = vpop.permute.xlu1 %571 }
 0x29c   :  { %2057 = vmatpush.xpose.msk.msrb.mxu1 %vm247_vm13, %v572_v55 }
 0x312   :  { %v269_v58 = vpop.f32.mrf.mxu2 }
 0x313   :  { %v299_v59 = vmul.f32 0.35355338, %v269_v58 }
 0x315   :  { %v301_v60 = vadd.f32 %v299_v59, %v2500_v57 }
 0x317   :  { %v303_v61 = vsel %vm247_vm13, %v301_v60, -inf }
 0x318   :  { %304 = vmax.xlane.f32.xlu1 %v303_v61 }
 0x31a   :  { %v296_v62 = vpop.f32.mrf.mxu3 }
 0x31b   :  { %v300_v63 = vmul.f32 0.35355338, %v296_v62 }
 0x31d   :  { %v302_v0 = vadd.f32 %v300_v63, %v2500_v57 }
 0x31f   :  { %v306_v1 = vsel %vm247_vm13, %v302_v0, -inf }
 0x320   :  { %307 = vmax.xlane.f32.xlu2 %v306_v1 }
 0x338   :  { %351 = vrot.lane.b32.xlu2 %v2482_v50, %s2257_s11 }
 0x340   :  { %405 = vrot.lane.b32.xlu2 %v2482_v50, %s2258_s12 }
 0x348   :  { %569 = vrot.lane.b32.xlu2 %v2478_v48, %s2259_s13 }
 0x38b   :  { %v305_v36 = vpop.xlane.xlu1 %304 }
 0x38c   :  { %v309_v37 = vsub.f32 %v301_v60, %v305_v36 }
 0x38e   :  { %v311_v3 = vmul.f32 1.442695, %v309_v37 }
 0x390   :  { %2166 = vpow2.f32 %v311_v3 }
 0x393   :  { %v308_v4 = vpop.xlane.xlu2 %307 }
 0x394   :  { %v310_v5 = vsub.f32 %v302_v0, %v308_v4 }
 0x396   :  { %v2167_v6 = vpop.eup %2166  ;;  %v313_v7 = vmul.f32 1.442695, %v310_v5 }
 0x397   :  { %v315_v8 = vsel %vm247_vm13, %v2167_v6, 0.0 }
 0x398   :  { %2168 = vpow2.f32 %v313_v7  ;;  %316 = vadd.xlane.f32.xlu2 %v315_v8 }
 0x39b   :  { %v352_v9 = vpop.permute.xlu2 %351 }
 0x39c   :  { %372 = vmatpush.msra.mxu2 %v352_v9 }
 0x39e   :  { %2049 = vmatpush.xpose.msk.msrb.mxu2 %vm247_vm13, %v408_v53  ;;  %v2169_v10 = vpop.eup %2168 }
 0x39f   :  { %v318_v11 = vsel %vm247_vm13, %v2169_v10, 0.0 }
 0x3a0   :  { %319 = vadd.xlane.f32.xlu0 %v318_v11 }
 0x3a3   :  { %v406_v12 = vpop.permute.xlu2 %405 }
 0x3ab   :  { %v570_v13 = vpop.permute.xlu2 %569 }
 0x3ac   :  { %2058 = vmatmul.msk.f32.vlgmr.msrb.gmra.mxu1 %vm247_vm13, %v570_v13 }
 0x3b0   :  { %379 = vrot.lane.b32.xlu2 %v2478_v48, %s2254_s29 }
 0x3b4   :  { %325 = vrot.lane.b32.xlu0 %v2478_v48, %s2257_s11 }
 0x3b8   :  { %599 = vrot.lane.b32.xlu2 %v2482_v50, %s2255_s30 }
 0x3c0   :  { %597 = vrot.lane.b32.xlu2 %v2482_v50, %s2259_s13 }
 0x3c8   :  { %734 = vrot.lane.b32.xlu2 %v2478_v48, %s2260_s14 }
 0x3d0   :  { %764 = vrot.lane.b32.xlu2 %v2482_v50, %s2261_s15 }
 0x40b   :  { %v317_v16 = vpop.xlane.xlu2 %316 }
 0x413   :  { %v320_v14 = vpop.xlane.xlu0 %319  ;;  %v380_v21 = vpop.permute.xlu2 %379 }
 0x414   :  { %2170 = vrcp.f32 %v320_v14 }
 0x415   :  { %2172 = vrcp.f32 %v317_v16 }
 0x41a   :  { %v2171_v15 = vpop.eup %2170 }
 0x41b   :  { %v324_v17 = vmul.f32 %v2171_v15, %v2169_v10  ;;  %v2173_v18 = vpop.eup %2172  ;;  %v600_v51 = vpop.permute.xlu2 %599 }
 0x41c   :  { %v323_v20 = vmul.f32 %v2173_v18, %v2167_v6 }
 0x41d   :  { %2046 = vmatmul.msk.f32.vlgmr.msra.gmra.mxu2 %vm247_vm13, %v324_v17 }
 0x423   :  { %v598_v58 = vpop.permute.xlu2 %597 }
 0x425   :  { %2050 = vmatmul.msk.f32.vlgmr.msrb.gmra.mxu2 %vm247_vm13, %v406_v12 }
 0x426   :  { %v326_v19 = vpop.permute.xlu0 %325 }
 0x427   :  { %346 = vmatpush.msrb.mxu3 %v326_v19 }
 0x428   :  { %2045 = vmatmul.msk.f32.vlgmr.msrb.gmra.mxu3 %vm247_vm13, %v323_v20 }
 0x429   :  { %2047 = vmatpush.xpose.msk.msra.mxu3 %vm247_vm13, %v380_v21  ;;  %v594_v22 = vpop.f32.mrf.mxu1 }
 0x42a   :  { %v625_v24 = vmul.f32 0.35355338, %v594_v22 }
 0x42b   :  { %v735_v60 = vpop.permute.xlu2 %734 }
 0x42c   :  { %v627_v25 = vadd.f32 %v625_v24, %v2500_v57 }
 0x42e   :  { %v629_v26 = vsel %vm247_vm13, %v627_v25, -inf }
 0x42f   :  { %630 = vmax.xlane.f32.xlu1 %v629_v26 }
 0x433   :  { %v765_v63 = vpop.permute.xlu2 %764 }
 0x448   :  { %377 = vrot.lane.b32.xlu1 %v2478_v48, %s2258_s12 }
 0x4a0   :  { %v374_v28 = vpop.f32.mrf.mxu2 }
 0x4a2   :  { %v631_v34 = vpop.xlane.xlu1 %630 }
 0x4a3   :  { %v635_v38 = vsub.f32 %v627_v25, %v631_v34 }
 0x4a5   :  { %v637_v39 = vmul.f32 1.442695, %v635_v38 }
 0x4a7   :  { %2174 = vpow2.f32 %v637_v39 }
 0x4a8   :  { %v430_v29 = vpop.f32.mrf.mxu2 }
 0x4a9   :  { %v434_v30 = vmul.f32 0.35355338, %v430_v29 }
 0x4ab   :  { %v348_v31 = vpop.f32.mrf.mxu3  ;;  %v436_v32 = vadd.f32 %v434_v30, %v2500_v57 }
 0x4ac   :  { %2055 = vmatmul.msk.f32.vlgmr.msrb.gmra.mxu0 %vm247_vm13, %v348_v31 }
 0x4ad   :  { %v440_v33 = vsel %vm247_vm13, %v436_v32, -inf  ;;  %v2175_v40 = vpop.eup %2174 }
 0x4ae   :  { %441 = vmax.xlane.f32.xlu0 %v440_v33  ;;  %v641_v41 = vsel %vm247_vm13, %v2175_v40, 0.0 }
 0x4b4   :  { %2056 = vmatmul.msk.f32.gmra.mxu0 %vm247_vm13, %v374_v28 }
 0x4ba   :  { %v378_v35 = vpop.permute.xlu1 %377 }
 0x4bb   :  { %2048 = vmatmul.msk.f32.vlgmr.msra.gmra.mxu3 %vm247_vm13, %v378_v35 }
 0x4c2   :  { %485 = vrot.lane.b32.xlu0 %v2482_v50, %s2262_s18 }
 0x4ec   :  { %642 = vadd.xlane.f32.xlu0 %v641_v41 }
 0x521   :  { %v442_v42 = vpop.xlane.xlu0 %441 }
 0x522   :  { %v444_v43 = vsub.f32 %v436_v32, %v442_v42 }
 0x524   :  { %v447_v44 = vmul.f32 1.442695, %v444_v43 }
 0x526   :  { %2176 = vpow2.f32 %v447_v44 }
 0x529   :  { %v2565_v10 = vpop.f32.mrf.mxu0 }
 0x52c   :  { %v2177_v45 = vpop.eup %2176 }
 0x52d   :  { %v452_v47 = vsel %vm247_vm13, %v2177_v45, 0.0 }
 0x52e   :  { %453 = vadd.xlane.f32.xlu1 %v452_v47 }
 0x531   :  { %v2569_v12 = vpop.f32.mrf.mxu0 }
 0x534   :  { %v486_v49 = vpop.permute.xlu0 %485 }
 0x535   :  { %506 = vmatpush.msra.mxu2 %v486_v49 }
 0x537   :  { %2059 = vmatpush.xpose.msk.msrb.mxu2 %vm247_vm13, %v600_v51 }
 0x53e   :  { %v402_v53 = vpop.f32.mrf.mxu3 }
 0x53f   :  { %v433_v54 = vmul.f32 0.35355338, %v402_v53 }
 0x541   :  { %v435_v55 = vadd.f32 %v433_v54, %v2500_v57 }
 0x543   :  { %v437_v56 = vsel %vm247_vm13, %v435_v55, -inf }
 0x544   :  { %438 = vmax.xlane.f32.xlu2 %v437_v56 }
 0x547   :  { %736 = vrot.lane.b32.xlu1 %v2478_v48, %s2261_s15 }
 0x54f   :  { %651 = vrot.lane.b32.xlu1 %v2478_v48, %s2263_s6 }
 0x557   :  { %762 = vrot.lane.b32.xlu1 %v2482_v50, %s2260_s14 }
 0x55f   :  { %v643_v0 = vpop.xlane.xlu0 %642 }
 0x5a1   :  { %v454_v59 = vpop.xlane.xlu1 %453 }
 0x5a2   :  { %2178 = vrcp.f32 %v454_v59 }
 0x5a3   :  { %2180 = vrcp.f32 %v643_v0 }
 0x5a8   :  { %v2179_v61 = vpop.eup %2178 }
 0x5a9   :  { %v458_v62 = vmul.f32 %v2179_v61, %v2177_v45  ;;  %v2181_v4 = vpop.eup %2180 }
 0x5aa   :  { %v649_v5 = vmul.f32 %v2181_v4, %v2175_v40 }
 0x5ab   :  { %2052 = vmatmul.msk.f32.vlgmr.msra.gmra.mxu2 %vm247_vm13, %v458_v62 }
 0x5b3   :  { %2060 = vmatmul.msk.f32.vlgmr.msrb.gmra.mxu2 %vm247_vm13, %v598_v58  ;;  %v241_v58 = vld [vmem:[%s3009_s3 + $0x8] sm:$0xff] }
 0x5b7   :  { %v439_v1 = vpop.xlane.xlu2 %438 }
 0x5b8   :  { %v443_v36 = vsub.f32 %v435_v55, %v439_v1 }
 0x5b9   :  { %v737_v37 = vpop.permute.xlu1 %736 }
 0x5ba   :  { %v445_v3 = vmul.f32 1.442695, %v443_v36  ;;  %2065 = vmatpush.xpose.msk.msra.mxu0 %vm247_vm13, %v737_v37  ;;  %v243_v36 = vld [vmem:[%s3009_s3 + $0x18] sm:$0xff] }
 0x5bc   :  { %2182 = vpow2.f32 %v445_v3 }
 0x5bd   :  { %2066 = vmatmul.msk.f32.vlgmr.msra.gmra.mxu0 %vm247_vm13, %v735_v60 }
 0x5c1   :  { %v652_v6 = vpop.permute.xlu1 %651 }
 0x5c2   :  { %v2183_v7 = vpop.eup %2182  ;;  %672 = vmatpush.msra.mxu1 %v652_v6 }
 0x5c3   :  { %2061 = vmatmul.msk.f32.vlgmr.msra.gmra.mxu1 %vm247_vm13, %v649_v5  ;;  %v449_v8 = vsel %vm247_vm13, %v2183_v7, 0.0 }
 0x5c4   :  { %2067 = vmatpush.xpose.msk.msrb.mxu1 %vm247_vm13, %v765_v63  ;;  %450 = vadd.xlane.f32.xlu2 %v449_v8 }
 0x5c8   :  { %889 = vmatpush.msra.mxu1 %v243_v36 }
 0x5c9   :  { %v763_v9 = vpop.permute.xlu1 %762 }
 0x5cb   :  { %2068 = vmatmul.msk.f32.vlgmr.msrb.gmra.mxu1 %vm247_vm13, %v763_v9 }
 0x62e   :  { %v2567_v11 = vpop.f32.mrf.mxu2 }
 0x636   :  { %v622_v13 = vpop.f32.mrf.mxu2 }
 0x637   :  { %v626_v14 = vmul.f32 0.35355338, %v622_v13  ;;  %v451_v43 = vpop.xlane.xlu2 %450 }
 0x639   :  { %v628_v15 = vadd.f32 %v626_v14, %v2500_v57  ;;  %v901_v14 = vperm.slane %v2469_v23, 3 }
 0x63a   :  { %v759_v16 = vpop.f32.mrf.mxu0 }
 0x63b   :  { %v790_v17 = vmul.f32 0.35355338, %v759_v16  ;;  %v632_v18 = vsel %vm247_vm13, %v628_v15, -inf }
 0x63c   :  { %633 = vmax.xlane.f32.xlu1 %v632_v18 }
 0x63d   :  { %v792_v19 = vadd.f32 %v790_v17, %v2500_v57 }
 0x63f   :  { %v794_v20 = vsel %vm247_vm13, %v792_v19, -inf }
 0x640   :  { %v2575_v21 = vpop.f32.mrf.mxu1  ;;  %795 = vmax.xlane.f32.xlu0 %v794_v20 }
 0x648   :  { %v787_v22 = vpop.f32.mrf.mxu1 }
 0x649   :  { %v791_v24 = vmul.f32 0.35355338, %v787_v22 }
 0x64b   :  { %v793_v25 = vadd.f32 %v791_v24, %v2500_v57 }
 0x64d   :  { %v797_v26 = vsel %vm247_vm13, %v793_v25, -inf }
 0x64e   :  { %798 = vmax.xlane.f32.xlu0 %v797_v26 }
 0x655   :  { %677 = vrot.lane.b32.xlu1 %v2482_v50, %s2263_s6 }
 0x662   :  { %459 = vrot.lane.b32.xlu0 %v2478_v48, %s2262_s18 }
 0x6af   :  { %v634_v27 = vpop.xlane.xlu1 %633 }
 0x6b0   :  { %v636_v28 = vsub.f32 %v628_v15, %v634_v27 }
 0x6b2   :  { %v639_v29 = vmul.f32 1.442695, %v636_v28  ;;  %v961_v28 = vld [vmem:[%s3010_s4 + $0x18] sm:$0xff] }
 0x6b3   :  { %v796_v30 = vpop.xlane.xlu0 %795 }
 0x6b4   :  { %2184 = vpow2.f32 %v639_v29  ;;  %v800_v31 = vsub.f32 %v792_v19, %v796_v30  ;;  %v959_v29 = vld [vmem:[%s3010_s4 + $0x8] sm:$0xff] }
 0x6b6   :  { %v802_v32 = vmul.f32 1.442695, %v800_v31  ;;  %v958_v31 = vld [vmem:[%s3010_s4] sm:$0xff] }
 0x6b8   :  { %2186 = vpow2.f32 %v802_v32 }
 0x6ba   :  { %v2185_v33 = vpop.eup %2184 }
 0x6bb   :  { %v644_v34 = vsel %vm247_vm13, %v2185_v33, 0.0 }
 0x6bc   :  { %645 = vadd.xlane.f32.xlu1 %v644_v34 }
 0x6be   :  { %v2187_v35 = vpop.eup %2186 }
 0x6bf   :  { %v806_v38 = vsel %vm247_vm13, %v2187_v35, 0.0 }
 0x6c0   :  { %807 = vadd.xlane.f32.xlu2 %v806_v38 }
 0x6c1   :  { %v799_v39 = vpop.xlane.xlu0 %798 }
 0x6c2   :  { %v801_v40 = vsub.f32 %v793_v25, %v799_v39 }
 0x6c4   :  { %v804_v41 = vmul.f32 1.442695, %v801_v40 }
 0x6c6   :  { %2188 = vpow2.f32 %v804_v41 }
 0x6c7   :  { %v678_v42 = vpop.permute.xlu1 %677  ;;  %2190 = vrcp.f32 %v451_v43  ;;  %v1025_v43 = vld [vmem:[%s3011_s5 + $0x78] sm:$0xff] }
 0x6c8   :  { %698 = vmatpush.msra.mxu2 %v678_v42 }
 0x6cc   :  { %v2189_v44 = vpop.eup %2188 }
 0x6cd   :  { %v809_v45 = vsel %vm247_vm13, %v2189_v44, 0.0  ;;  %v2191_v47 = vpop.eup %2190 }
 0x6ce   :  { %810 = vadd.xlane.f32.xlu0 %v809_v45  ;;  %v457_v49 = vmul.f32 %v2191_v47, %v2183_v7 }
 0x6d4   :  { %v460_v51 = vpop.permute.xlu0 %459 }
 0x6d5   :  { %842 = vrot.lane.b32.xlu1 %v2482_v50, %s2264_s19  ;;  %480 = vmatpush.msrb.mxu3 %v460_v51 }
 0x6d6   :  { %2051 = vmatmul.msk.f32.vlgmr.msrb.gmra.mxu3 %vm247_vm13, %v457_v49 }
 0x6d7   :  { %532 = vmatpush.msra.mxu3 %v241_v58 }
 0x6d8   :  { %816 = vrot.lane.b32.xlu2 %v2478_v48, %s2264_s19  ;;  %v242_v48 = vld [vmem:[%s3009_s3 + $0x10] sm:$0xff] }
 0x6d9   :  { %724 = vmatpush.msrb.mxu3 %v242_v48  ;;  %v952_v48 = vperm.slane %v2469_v23, 4 }
 0x72f   :  { %v646_v53 = vpop.xlane.xlu1 %645 }
 0x730   :  { %2192 = vrcp.f32 %v646_v53  ;;  %v1023_v53 = vld [vmem:[%s3011_s5 + $0x68] sm:$0xff] }
 0x733   :  { %v808_v54 = vpop.xlane.xlu2 %807 }
 0x734   :  { %2194 = vrcp.f32 %v808_v54 }
 0x736   :  { %v2193_v55 = vpop.eup %2192 }
 0x737   :  { %v650_v56 = vmul.f32 %v2193_v55, %v2185_v33 }
 0x739   :  { %2062 = vmatmul.msk.f32.vlgmr.msra.gmra.mxu2 %vm247_vm13, %v650_v56  ;;  %v1022_v56 = vld [vmem:[%s3011_s5 + $0x60] sm:$0xff] }
 0x73a   :  { %v2195_v59 = vpop.eup %2194 }
 0x73b   :  { %v817_v50 = vpop.permute.xlu2 %816  ;;  %v814_v60 = vmul.f32 %v2195_v59, %v2187_v35 }
 0x73c   :  { %837 = vmatpush.msrb.mxu2 %v817_v50 }
 0x73e   :  { %981 = vmatpush.msra.mxu2 %v961_v28 }
 0x741   :  { %v811_v61 = vpop.xlane.xlu0 %810  ;;  %2069 = vmatmul.msk.f32.vlgmr.msrb.gmra.mxu2 %vm247_vm13, %v814_v60 }
 0x742   :  { %2196 = vrcp.f32 %v811_v61 }
 0x747   :  { %v843_v62 = vpop.permute.xlu1 %842 }
 0x748   :  { %v2197_v63 = vpop.eup %2196  ;;  %863 = vmatpush.msrb.mxu0 %v843_v62 }
 0x749   :  { %v815_v0 = vmul.f32 %v2197_v63, %v2189_v44  ;;  %v1024_v44 = vld [vmem:[%s3011_s5 + $0x70] sm:$0xff] }
 0x74b   :  { %2070 = vmatmul.msk.f32.vlgmr.msrb.gmra.mxu0 %vm247_vm13, %v815_v0  ;;  %v955_v0 = vperm.slane %v2469_v23, 5 }
 0x759   :  { %v482_v1 = vpop.f32.mrf.mxu3 }
 0x75a   :  { %2053 = vmatmul.msk.f32.vlgmr.msra.gmra.mxu3 %vm247_vm13, %v482_v1 }
 0x75b   :  { %1027 = vmatpush.msra.mxu3 %v1025_v43 }
 0x75d   :  { %1028 = vmatpush.msra.mxu3 %v1024_v44 }
 0x75f   :  { %1029 = vmatpush.msra.mxu3 %v1023_v53 }
 0x761   :  { %1030 = vmatpush.msra.mxu3 %v1022_v56 }
 0x762   :  { %2054 = vmatmul.msk.f32.gmra.mxu3 %vm247_vm13, %v2567_v11 }
 0x76a   :  { %2063 = vmatmul.msk.f32.vlgmr.msrb.gmra.mxu3 %vm247_vm13, %v2575_v21 }
 0x7bc   :  { %v700_v37 = vpop.f32.mrf.mxu2 }
 0x7bd   :  { %2064 = vmatmul.msk.f32.gmra.mxu3 %vm247_vm13, %v700_v37 }
 0x7c4   :  { %v839_v3 = vpop.f32.mrf.mxu2 }
 0x7c5   :  { %2071 = vmatmul.msk.f32.vlgmr.msra.gmra.mxu1 %vm247_vm13, %v839_v3 }
 0x7c8   :  { %v865_v4 = vpop.f32.mrf.mxu0 }
 0x7cd   :  { %2072 = vmatmul.msk.f32.gmra.mxu1 %vm247_vm13, %v865_v4 }
 0x7dd   :  { %v534_v5 = vpop.f32.mrf.mxu3 }
 0x7de   :  { %v564_v8 = vadd.f32 %v2565_v10, %v534_v5 }
 0x7e5   :  { %v537_v6 = vpop.f32.mrf.mxu3 }
 0x7e6   :  { %v567_v17 = vadd.f32 %v2569_v12, %v537_v6 }
 0x7ed   :  { %v726_v7 = vpop.f32.mrf.mxu3 }
 0x7ee   :  { %v732_v9 = vadd.f32 %v726_v7, %v564_v8 }
 0x840   :  { %v729_v16 = vpop.f32.mrf.mxu3 }
 0x841   :  { %v733_v19 = vadd.f32 %v729_v16, %v567_v17  ;;  %v1020_v16 = vld [vmem:[%s3011_s5 + $0x50] sm:$0xff]  ;;  %v1019_v17 = vld [vmem:[%s3011_s5 + $0x48] sm:$0xff] }
 0x842   :  { %v891_v11 = vpop.f32.mrf.mxu1 }
 0x843   :  { %v897_v13 = vadd.f32 %v891_v11, %v732_v9 }
 0x845   :  { %v899_v15 = vadd.f32 %v897_v13, %v2434_v46 }
 0x847   :  { %v2615_v18 = vadd.f32 %v901_v14, %v899_v15  ;;  %v1021_v15 = vld [vmem:[%s3011_s5 + $0x58] sm:$0xff] }
 0x848   :  { %1031 = vmatpush.msra.mxu3 %v1021_v15 }
 0x849   :  { %v904_v20 = vsel %vm144_vm5, %v2615_v18, 0.0  ;;  %v912_v21 = vmul.f32 %v2615_v18, %v2615_v18 }
 0x84a   :  { %905 = vadd.xlane.f32.xlu2 %v904_v20  ;;  %v894_v10 = vpop.f32.mrf.mxu1  ;;  %1032 = vmatpush.msra.mxu3 %v1020_v16  ;;  %v1017_v20 = vld [vmem:[%s3011_s5 + $0x38] sm:$0xff] }
 0x84b   :  { %v898_v22 = vadd.f32 %v894_v10, %v733_v19  ;;  %v914_v24 = vsel %vm144_vm5, %v912_v21, 0.0  ;;  %v1018_v19 = vld [vmem:[%s3011_s5 + $0x40] sm:$0xff]  ;;  %v1016_v21 = vld [vmem:[%s3011_s5 + $0x30] sm:$0xff]  ;;  %v1015_v10 = vld [vmem:[%s3011_s5 + $0x28] sm:$0xff] }
 0x84c   :  { %915 = vadd.xlane.f32.xlu1 %v914_v24  ;;  %1033 = vmatpush.msra.mxu3 %v1019_v17  ;;  %v1013_v24 = vld [vmem:[%s3011_s5 + $0x18] sm:$0xff] }
 0x84d   :  { %v900_v46 = vadd.f32 %v898_v22, %v2440_v52  ;;  %v960_v52 = vld [vmem:[%s3010_s4 + $0x10] sm:$0xff]  ;;  %v1014_v22 = vld [vmem:[%s3011_s5 + $0x20] sm:$0xff] }
 0x84e   :  { %982 = vmatpush.msra.mxu2 %v960_v52  ;;  %1034 = vmatpush.msra.mxu3 %v1018_v19 }
 0x84f   :  { %v2623_v25 = vadd.f32 %v901_v14, %v900_v46  ;;  %v1012_v46 = vld [vmem:[%s3011_s5 + $0x10] sm:$0xff] }
 0x850   :  { %983 = vmatpush.msra.mxu2 %v959_v29  ;;  %1035 = vmatpush.msra.mxu3 %v1017_v20 }
 0x851   :  { %v907_v12 = vsel %vm144_vm5, %v2623_v25, 0.0  ;;  %v913_v26 = vmul.f32 %v2623_v25, %v2623_v25 }
 0x852   :  { %908 = vadd.xlane.f32.xlu0 %v907_v12  ;;  %984 = vmatpush.msra.mxu2 %v958_v31  ;;  %v1011_v12 = vld [vmem:[%s3011_s5 + $0x8] sm:$0xff] }
 0x853   :  { %v917_v27 = vsel %vm144_vm5, %v913_v26, 0.0  ;;  %1036 = vmatpush.msra.mxu3 %v1016_v21  ;;  %v1010_v26 = vld [vmem:[%s3011_s5] sm:$0xff] }
 0x855   :  { %1037 = vmatpush.msra.mxu3 %v1015_v10 }
 0x857   :  { %1038 = vmatpush.msra.mxu3 %v1014_v22 }
 0x859   :  { %1039 = vmatpush.msra.mxu3 %v1013_v24  ;;  %v2737_v24 = vld [vmem:[%s3008_s1 + $0x8] sm:$0xff] }
 0x85a   :  { %918 = vadd.xlane.f32.xlu0 %v917_v27  ;;  %v962_v27 = vperm.slane %v2469_v23, 6 }
 0x85b   :  { %1040 = vmatpush.msra.mxu3 %v1012_v46 }
 0x85d   :  { %1041 = vmatpush.msra.mxu3 %v1011_v12 }
 0x85f   :  { %1042 = vmatpush.msra.mxu3 %v1010_v26 }
 0x8bd   :  { %v906_v30 = vpop.xlane.xlu2 %905 }
 0x8be   :  { %v910_v32 = vmul.f32 %v906_v30, %v2454_v2 }
 0x8bf   :  { %v916_v33 = vpop.xlane.xlu1 %915 }
 0x8c0   :  { %v922_v34 = vmul.f32 %v910_v32, %v910_v32  ;;  %v920_v35 = vmul.f32 %v916_v33, %v2454_v2  ;;  %v926_v61 = vsub.f32 %v2615_v18, %v910_v32 }
 0x8c2   :  { %v924_v38 = vsub.f32 %v920_v35, %v922_v34 }
 0x8c4   :  { %v928_v39 = vadd.f32 1e-05, %v924_v38 }
 0x8c5   :  { %v909_v40 = vpop.xlane.xlu0 %908 }
 0x8c6   :  { %2198 = vrsqrt.f32 %v928_v39  ;;  %v911_v41 = vmul.f32 %v909_v40, %v2454_v2  ;;  %vm936_vm15 = vweird.f32 %v928_v39 }
 0x8c8   :  { %v923_v49 = vmul.f32 %v911_v41, %v911_v41  ;;  %v927_v8 = vsub.f32 %v2623_v25, %v911_v41 }
 0x8cc   :  { %v2199_v42 = vpop.eup %2198 }
 0x8cd   :  { %v931_v45 = vmul.f32 %v2199_v42, %v928_v39  ;;  %v919_v47 = vpop.xlane.xlu0 %918  ;;  %vm937_vm14 = vweird.f32 %v2199_v42 }
 0x8ce   :  { %v921_v51 = vmul.f32 %v919_v47, %v2454_v2  ;;  %vm938_vm0 = vmor %vm936_vm15, %vm937_vm14 }
 0x8cf   :  { %v932_v54 = vmul.f32 %v2199_v42, %v931_v45 }
 0x8d0   :  { %v925_v55 = vsub.f32 %v921_v51, %v923_v49 }
 0x8d1   :  { %v933_v58 = vmul.f32 0.5, %v932_v54 }
 0x8d2   :  { %v929_v50 = vadd.f32 1e-05, %v925_v55  ;;  %v1026_v55 = vperm.slane %v2469_v23, 7 }
 0x8d3   :  { %v934_v59 = vsub.f32 1.5, %v933_v58 }
 0x8d4   :  { %2200 = vrsqrt.f32 %v929_v50  ;;  %vm946_vm2 = vweird.f32 %v929_v50 }
 0x8d5   :  { %v935_v60 = vmul.f32 %v2199_v42, %v934_v59 }
 0x8d7   :  { %v939_v62 = vsel %vm938_vm0, %v2199_v42, %v935_v60 }
 0x8d8   :  { %v950_v63 = vmul.f32 %v939_v62, %v926_v61 }
 0x8da   :  { %v2201_v1 = vpop.eup %2200  ;;  %v953_v36 = vmul.f32 %v952_v48, %v950_v63 }
 0x8db   :  { %v941_v37 = vmul.f32 %v2201_v1, %v929_v50  ;;  %vm947_vm1 = vweird.f32 %v2201_v1 }
 0x8dc   :  { %v956_v3 = vadd.f32 %v955_v0, %v953_v36  ;;  %vm948_vm3 = vmor %vm946_vm2, %vm947_vm1  ;;  %v2077_v36 = vld [vmem:[%s3007_s2 + $0x28] sm:$0xff] }
 0x8dd   :  { %v942_v4 = vmul.f32 %v2201_v1, %v941_v37 }
 0x8de   :  { %2073 = vmatmul.msk.f32.vlgmr.msra.gmra.mxu2 %vm144_vm5, %v956_v3  ;;  %v2076_v3 = vld [vmem:[%s3007_s2 + $0x20] sm:$0xff] }
 0x8df   :  { %v943_v5 = vmul.f32 0.5, %v942_v4 }
 0x8e1   :  { %v944_v6 = vsub.f32 1.5, %v943_v5 }
 0x8e3   :  { %v945_v7 = vmul.f32 %v2201_v1, %v944_v6 }
 0x8e5   :  { %v949_v9 = vsel %vm948_vm3, %v2201_v1, %v945_v7  ;;  %v2079_v1 = vld [vmem:[%s3007_s2 + $0x38] sm:$0xff] }
 0x8e6   :  { %v951_v11 = vmul.f32 %v949_v9, %v927_v8  ;;  %1132 = vmatpush.msra.mxu0 %v2079_v1 }
 0x8e8   :  { %v954_v13 = vmul.f32 %v952_v48, %v951_v11 }
 0x8ea   :  { %v957_v14 = vadd.f32 %v955_v0, %v954_v13 }
 0x8ec   :  { %2074 = vmatmul.msk.f32.gmra.mxu2 %vm144_vm5, %v957_v14 }
 0x961   :  { %v986_v28 = vpop.f32.mrf.mxu2 }
 0x962   :  { %v987_v52 = vadd.f32 %v986_v28, %v962_v27 }
 0x964   :  { %v994_v29 = vmul.f32 0.044715, %v987_v52  ;;  %v992_v41 = vmul.f32 0.5, %v987_v52 }
 0x966   :  { %v996_v30 = vmul.f32 %v994_v29, %v987_v52  ;;  %v1105_v29 = vperm.slane %v2737_v24, 1 }
 0x968   :  { %v998_v31 = vmul.f32 %v996_v30, %v987_v52 }
 0x96a   :  { %v1000_v32 = vadd.f32 %v998_v31, %v987_v52 }
 0x96c   :  { %v1002_v33 = vmul.f32 0.7978846, %v1000_v32 }
 0x96e   :  { %2202 = vtanh.f32 %v1002_v33 }
 0x96f   :  { %v989_v34 = vpop.f32.mrf.mxu2 }
 0x970   :  { %v990_v35 = vadd.f32 %v989_v34, %v962_v27  ;;  %v1102_v27 = vperm.slane %v2737_v24, 0 }
 0x972   :  { %v995_v38 = vmul.f32 0.044715, %v990_v35  ;;  %v993_v51 = vmul.f32 0.5, %v990_v35 }
 0x974   :  { %v2203_v39 = vpop.eup %2202  ;;  %v997_v40 = vmul.f32 %v995_v38, %v990_v35 }
 0x975   :  { %v1006_v42 = vadd.f32 1.0, %v2203_v39 }
 0x976   :  { %v999_v43 = vmul.f32 %v997_v40, %v990_v35 }
 0x977   :  { %v1008_v44 = vmul.f32 %v1006_v42, %v992_v41 }
 0x978   :  { %v1001_v45 = vadd.f32 %v999_v43, %v990_v35 }
 0x979   :  { %1043 = vmatmul.f32.vlgmr.msra.gmra.mxu3 %v1008_v44 }
 0x97a   :  { %v1003_v47 = vmul.f32 0.7978846, %v1001_v45  ;;  %v1113_v45 = vperm.slane %v2737_v24, 2 }
 0x97c   :  { %2204 = vtanh.f32 %v1003_v47 }
 0x982   :  { %v2205_v49 = vpop.eup %2204 }
 0x983   :  { %v1007_v53 = vadd.f32 1.0, %v2205_v49 }
 0x985   :  { %v1009_v54 = vmul.f32 %v1007_v53, %v993_v51 }
 0x987   :  { %1046 = vmatmul.f32.gmra.mxu3 %v1009_v54 }
 0x9fc   :  { %v1044_v56 = vpop.f32.mrf.mxu3 }
 0x9fd   :  { %v1045_v58 = vadd.f32 %v1044_v56, %v1026_v55 }
 0x9ff   :  { %v2703_v50 = vadd.f32 %v1045_v58, %v2615_v18 }
 0xa01   :  { %v1054_v59 = vsel %vm144_vm5, %v2703_v50, 0.0  ;;  %v1062_v60 = vmul.f32 %v2703_v50, %v2703_v50 }
 0xa02   :  { %1055 = vadd.xlane.f32.xlu2 %v1054_v59 }
 0xa03   :  { %v1064_v61 = vsel %vm144_vm5, %v1062_v60, 0.0 }
 0xa04   :  { %1065 = vadd.xlane.f32.xlu0 %v1064_v61 }
 0xa0a   :  { %v1047_v48 = vpop.f32.mrf.mxu3 }
 0xa0b   :  { %v1048_v62 = vadd.f32 %v1047_v48, %v1026_v55 }
 0xa0d   :  { %v2711_v63 = vadd.f32 %v1048_v62, %v2623_v25  ;;  %v2078_v25 = vld [vmem:[%s3007_s2 + $0x30] sm:$0xff] }
 0xa0e   :  { %1133 = vmatpush.msra.mxu0 %v2078_v25 }
 0xa0f   :  { %v1057_v23 = vsel %vm144_vm5, %v2711_v63, 0.0  ;;  %v1063_v18 = vmul.f32 %v2711_v63, %v2711_v63 }
 0xa10   :  { %1058 = vadd.xlane.f32.xlu1 %v1057_v23  ;;  %1134 = vmatpush.msra.mxu0 %v2077_v36 }
 0xa11   :  { %v1067_v0 = vsel %vm144_vm5, %v1063_v18, 0.0 }
 0xa12   :  { %1068 = vadd.xlane.f32.xlu2 %v1067_v0  ;;  %1135 = vmatpush.msra.mxu0 %v2076_v3 }
 0xa75   :  { %v1056_v37 = vpop.xlane.xlu2 %1055 }
 0xa76   :  { %v1060_v4 = vmul.f32 %v1056_v37, %v2454_v2 }
 0xa77   :  { %v1066_v5 = vpop.xlane.xlu0 %1065 }
 0xa78   :  { %v1072_v6 = vmul.f32 %v1060_v4, %v1060_v4  ;;  %v1070_v7 = vmul.f32 %v1066_v5, %v2454_v2  ;;  %v1076_v26 = vsub.f32 %v2703_v50, %v1060_v4 }
 0xa7a   :  { %v1074_v8 = vsub.f32 %v1070_v7, %v1072_v6 }
 0xa7c   :  { %v1078_v9 = vadd.f32 1e-05, %v1074_v8 }
 0xa7e   :  { %2206 = vrsqrt.f32 %v1078_v9  ;;  %vm1086_vm6 = vweird.f32 %v1078_v9 }
 0xa83   :  { %v1059_v11 = vpop.xlane.xlu1 %1058 }
 0xa84   :  { %v2207_v13 = vpop.eup %2206  ;;  %v1061_v14 = vmul.f32 %v1059_v11, %v2454_v2 }
 0xa85   :  { %v1081_v15 = vmul.f32 %v2207_v13, %v1078_v9  ;;  %v1069_v16 = vpop.xlane.xlu2 %1068  ;;  %vm1087_vm4 = vweird.f32 %v2207_v13 }
 0xa86   :  { %v1073_v17 = vmul.f32 %v1061_v14, %v1061_v14  ;;  %v1071_v19 = vmul.f32 %v1069_v16, %v2454_v2  ;;  %vm1088_vm7 = vmor %vm1086_vm6, %vm1087_vm4  ;;  %v1077_v40 = vsub.f32 %v2711_v63, %v1061_v14 }
 0xa87   :  { %v1082_v20 = vmul.f32 %v2207_v13, %v1081_v15 }
 0xa88   :  { %v1075_v21 = vsub.f32 %v1071_v19, %v1073_v17 }
 0xa89   :  { %v1083_v10 = vmul.f32 0.5, %v1082_v20 }
 0xa8a   :  { %v1079_v22 = vadd.f32 1e-05, %v1075_v21 }
 0xa8b   :  { %v1084_v46 = vsub.f32 1.5, %v1083_v10 }
 0xa8c   :  { %2208 = vrsqrt.f32 %v1079_v22  ;;  %vm1096_vm9 = vweird.f32 %v1079_v22 }
 0xa8d   :  { %v1085_v12 = vmul.f32 %v2207_v13, %v1084_v46 }
 0xa8f   :  { %v1089_v28 = vsel %vm1088_vm7, %v2207_v13, %v1085_v12 }
 0xa90   :  { %v1100_v52 = vmul.f32 %v1089_v28, %v1076_v26 }
 0xa92   :  { %v2209_v30 = vpop.eup %2208  ;;  %v1103_v31 = vmul.f32 %v1102_v27, %v1100_v52 }
 0xa93   :  { %v1091_v32 = vmul.f32 %v2209_v30, %v1079_v22  ;;  %vm1097_vm8 = vweird.f32 %v2209_v30 }
 0xa94   :  { %v1106_v33 = vadd.f32 %v1105_v29, %v1103_v31  ;;  %vm1098_vm10 = vmor %vm1096_vm9, %vm1097_vm8 }
 0xa95   :  { %v1092_v34 = vmul.f32 %v2209_v30, %v1091_v32 }
 0xa96   :  { %2080 = vmatmul.msk.f32.vlgmr.msra.gmra.mxu0 %vm144_vm5, %v1106_v33 }
 0xa97   :  { %v1093_v35 = vmul.f32 0.5, %v1092_v34 }
 0xa99   :  { %v1094_v38 = vsub.f32 1.5, %v1093_v35 }
 0xa9b   :  { %v1095_v39 = vmul.f32 %v2209_v30, %v1094_v38  ;;  %v2082_v38 = vld [vmem:[%s3009_s3 + $0x20] sm:$0xff] }
 0xa9d   :  { %v1099_v41 = vsel %vm1098_vm10, %v2209_v30, %v1095_v39  ;;  %v2083_v39 = vld [vmem:[%s3009_s3 + $0x28] sm:$0xff] }
 0xa9e   :  { %v1101_v42 = vmul.f32 %v1099_v41, %v1077_v40  ;;  %1435 = vmatpush.msrb.mxu3 %v2083_v39 }
 0xaa0   :  { %v1104_v43 = vmul.f32 %v1102_v27, %v1101_v42 }
 0xaa2   :  { %v1107_v44 = vadd.f32 %v1105_v29, %v1104_v43 }
 0xaa4   :  { %2081 = vmatmul.msk.f32.gmra.mxu0 %vm144_vm5, %v1107_v44 }
 0xb13   :  { %v1137_v47 = vpop.f32.mrf.mxu0 }
 0xb14   :  { %v2746_v49 = vadd.f32 %v1137_v47, %v1113_v45 }
 0xb16   :  { %1282 = vrot.lane.b32.xlu2 %v2746_v49, %s2254_s29  ;;  %1149 = vrot.lane.b32.xlu0 %v2746_v49, %s2253_s28 }
 0xb1e   :  { %1280 = vrot.lane.b32.xlu0 %v2746_v49, %s2258_s12 }
 0xb21   :  { %v1140_v51 = vpop.f32.mrf.mxu0 }
 0xb22   :  { %v2754_v53 = vadd.f32 %v1140_v51, %v1113_v45 }
 0xb24   :  { %1176 = vrot.lane.b32.xlu1 %v2754_v53, %s2253_s28 }
 0xb70   :  { %v1283_v56 = vpop.permute.xlu2 %1282 }
 0xb88   :  { %v1150_v54 = vpop.permute.xlu0 %1149 }
 0xb89   :  { %2086 = vmatpush.xpose.msk.msrb.mxu1 %vm247_vm13, %v1150_v54 }
 0xb8c   :  { %2087 = vmatmul.msk.f32.vlgmr.msrb.gmra.mxu1 %vm247_vm13, %v2746_v49 }
 0xb90   :  { %v1281_v58 = vpop.permute.xlu0 %1280 }
 0xb96   :  { %v1177_v55 = vpop.permute.xlu1 %1176 }
 0xb97   :  { %2088 = vmatpush.xpose.msk.msrb.mxu2 %vm247_vm13, %v1177_v55 }
 0xb9a   :  { %2089 = vmatmul.msk.f32.vlgmr.msrb.gmra.mxu2 %vm247_vm13, %v2754_v53 }
 0xb9b   :  { %2092 = vmatpush.xpose.msk.msra.mxu2 %vm247_vm13, %v1283_v56 }
 0xba2   :  { %2093 = vmatmul.msk.f32.vlgmr.msra.gmra.mxu2 %vm247_vm13, %v1281_v58 }
 0xc09   :  { %v1172_v59 = vpop.f32.mrf.mxu1 }
 0xc0a   :  { %v1202_v60 = vmul.f32 0.35355338, %v1172_v59 }
 0xc0c   :  { %v1204_v61 = vadd.f32 %v1202_v60, %v2500_v57 }
 0xc0e   :  { %v1206_v48 = vsel %vm247_vm13, %v1204_v61, -inf }
 0xc0f   :  { %1207 = vmax.xlane.f32.xlu0 %v1206_v48 }
 0xc1d   :  { %v1199_v62 = vpop.f32.mrf.mxu2 }
 0xc1e   :  { %v1203_v23 = vmul.f32 0.35355338, %v1199_v62 }
 0xc20   :  { %v1205_v18 = vadd.f32 %v1203_v23, %v2500_v57 }
 0xc22   :  { %v1209_v0 = vsel %vm247_vm13, %v1205_v18, -inf }
 0xc23   :  { %1210 = vmax.xlane.f32.xlu1 %v1209_v0  ;;  %1308 = vrot.lane.b32.xlu0 %v2754_v53, %s2258_s12 }
 0xc25   :  { %v1305_v1 = vpop.f32.mrf.mxu2 }
 0xc26   :  { %v1336_v25 = vmul.f32 0.35355338, %v1305_v1 }
 0xc28   :  { %v1338_v36 = vadd.f32 %v1336_v25, %v2500_v57 }
 0xc2a   :  { %v1340_v37 = vsel %vm247_vm13, %v1338_v36, -inf }
 0xc2b   :  { %1341 = vmax.xlane.f32.xlu2 %v1340_v37 }
 0xc3c   :  { %1228 = vrot.lane.b32.xlu1 %v2746_v49, %s2257_s11 }
 0xc43   :  { %1310 = vrot.lane.b32.xlu2 %v2754_v53, %s2254_s29 }
 0xc82   :  { %v1208_v3 = vpop.xlane.xlu0 %1207 }
 0xc83   :  { %v1212_v4 = vsub.f32 %v1204_v61, %v1208_v3 }
 0xc85   :  { %v1214_v5 = vmul.f32 1.442695, %v1212_v4 }
 0xc87   :  { %2210 = vpow2.f32 %v1214_v5 }
 0xc8d   :  { %v2211_v6 = vpop.eup %2210 }
 0xc8e   :  { %v1218_v7 = vsel %vm247_vm13, %v2211_v6, 0.0 }
 0xc8f   :  { %1219 = vadd.xlane.f32.xlu0 %v1218_v7 }
 0xc95   :  { %v1309_v22 = vpop.permute.xlu0 %1308 }
 0xc96   :  { %v1211_v8 = vpop.xlane.xlu1 %1210 }
 0xc97   :  { %v1213_v9 = vsub.f32 %v1205_v18, %v1211_v8 }
 0xc99   :  { %v1216_v11 = vmul.f32 1.442695, %v1213_v9 }
 0xc9b   :  { %2212 = vpow2.f32 %v1216_v11 }
 0xc9e   :  { %v1342_v13 = vpop.xlane.xlu2 %1341 }
 0xc9f   :  { %v1346_v14 = vsub.f32 %v1338_v36, %v1342_v13 }
 0xca1   :  { %v2213_v15 = vpop.eup %2212  ;;  %v1348_v16 = vmul.f32 1.442695, %v1346_v14 }
 0xca2   :  { %v1221_v17 = vsel %vm247_vm13, %v2213_v15, 0.0 }
 0xca3   :  { %2214 = vpow2.f32 %v1348_v16  ;;  %1222 = vadd.xlane.f32.xlu2 %v1221_v17  ;;  %1254 = vrot.lane.b32.xlu0 %v2754_v53, %s2257_s11 }
 0xca6   :  { %v1311_v10 = vpop.permute.xlu2 %1310 }
 0xca9   :  { %v2215_v19 = vpop.eup %2214 }
 0xcaa   :  { %v1352_v20 = vsel %vm247_vm13, %v2215_v19, 0.0 }
 0xcab   :  { %1353 = vadd.xlane.f32.xlu1 %v1352_v20  ;;  %1362 = vrot.lane.b32.xlu0 %v2746_v49, %s2262_s18 }
 0xcae   :  { %v1229_v21 = vpop.permute.xlu1 %1228 }
 0xcaf   :  { %1249 = vmatpush.msrb.mxu0 %v1229_v21 }
 0xcb1   :  { %2094 = vmatpush.xpose.msk.msra.mxu0 %vm247_vm13, %v1311_v10 }
 0xcb3   :  { %1474 = vrot.lane.b32.xlu0 %v2746_v49, %s2255_s30 }
 0xcbb   :  { %1472 = vrot.lane.b32.xlu0 %v2746_v49, %s2259_s13 }
 0xcc4   :  { %1502 = vrot.lane.b32.xlu1 %v2754_v53, %s2255_s30 }
 0xd02   :  { %v1220_v46 = vpop.xlane.xlu0 %1219 }
 0xd03   :  { %2216 = vrcp.f32 %v1220_v46 }
 0xd09   :  { %v2217_v12 = vpop.eup %2216 }
 0xd0a   :  { %v1226_v26 = vmul.f32 %v2217_v12, %v2211_v6 }
 0xd0c   :  { %2090 = vmatmul.msk.f32.vlgmr.msrb.gmra.mxu0 %vm247_vm13, %v1226_v26 }
 0xd0d   :  { %1464 = vmatpush.msrb.mxu0 %v2082_v38 }
 0xd14   :  { %2095 = vmatmul.msk.f32.vlgmr.msra.gmra.mxu0 %vm247_vm13, %v1309_v22 }
 0xd15   :  { %v1255_v27 = vpop.permute.xlu0 %1254 }
 0xd16   :  { %v1223_v28 = vpop.xlane.xlu2 %1222  ;;  %1275 = vmatpush.msra.mxu1 %v1255_v27 }
 0xd17   :  { %2218 = vrcp.f32 %v1223_v28 }
 0xd1d   :  { %v2219_v52 = vpop.eup %2218  ;;  %v1363_v29 = vpop.permute.xlu0 %1362 }
 0xd1e   :  { %v1227_v30 = vmul.f32 %v2219_v52, %v2213_v15  ;;  %v1354_v31 = vpop.xlane.xlu1 %1353  ;;  %1383 = vmatpush.msrb.mxu1 %v1363_v29 }
 0xd1f   :  { %2220 = vrcp.f32 %v1354_v31 }
 0xd20   :  { %2091 = vmatmul.msk.f32.vlgmr.msra.gmra.mxu1 %vm247_vm13, %v1227_v30 }
 0xd25   :  { %v2221_v32 = vpop.eup %2220  ;;  %v1475_v33 = vpop.permute.xlu0 %1474 }
 0xd26   :  { %v1360_v34 = vmul.f32 %v2221_v32, %v2215_v19  ;;  %2102 = vmatpush.xpose.msk.msra.mxu1 %vm247_vm13, %v1475_v33  ;;  %v2084_v19 = vld [vmem:[%s3009_s3 + $0x30] sm:$0xff] }
 0xd27   :  { %1627 = vmatpush.msra.mxu3 %v2084_v19 }
 0xd28   :  { %2096 = vmatmul.msk.f32.vlgmr.msrb.gmra.mxu1 %vm247_vm13, %v1360_v34 }
 0xd2d   :  { %v1473_v35 = vpop.permute.xlu0 %1472 }
 0xd30   :  { %2103 = vmatmul.msk.f32.vlgmr.msra.gmra.mxu1 %vm247_vm13, %v1473_v35 }
 0xd36   :  { %v1503_v1 = vpop.permute.xlu1 %1502 }
 0xd89   :  { %v1251_v40 = vpop.f32.mrf.mxu0 }
 0xd8a   :  { %2100 = vmatmul.msk.f32.vlgmr.msrb.gmra.mxu0 %vm247_vm13, %v1251_v40 }
 0xd91   :  { %v1333_v41 = vpop.f32.mrf.mxu0 }
 0xd92   :  { %v1337_v42 = vmul.f32 0.35355338, %v1333_v41 }
 0xd94   :  { %v1339_v43 = vadd.f32 %v1337_v42, %v2500_v57 }
 0xd96   :  { %v1343_v44 = vsel %vm247_vm13, %v1339_v43, -inf }
 0xd97   :  { %1344 = vmax.xlane.f32.xlu0 %v1343_v44 }
 0xd9d   :  { %v1277_v45 = vpop.f32.mrf.mxu1 }
 0xd9e   :  { %2101 = vmatmul.msk.f32.gmra.mxu0 %vm247_vm13, %v1277_v45 }
 0xda5   :  { %v1385_v47 = vpop.f32.mrf.mxu1 }
 0xda6   :  { %2098 = vmatmul.msk.f32.vlgmr.msrb.gmra.mxu3 %vm247_vm13, %v1385_v47 }
 0xdad   :  { %v1497_v51 = vpop.f32.mrf.mxu1 }
 0xdae   :  { %v1528_v54 = vmul.f32 0.35355338, %v1497_v51 }
 0xdb0   :  { %v1530_v55 = vadd.f32 %v1528_v54, %v2500_v57 }
 0xdb2   :  { %v1532_v56 = vsel %vm247_vm13, %v1530_v55, -inf }
 0xdb3   :  { %1533 = vmax.xlane.f32.xlu2 %v1532_v56 }
 0xdcb   :  { %1388 = vrot.lane.b32.xlu2 %v2754_v53, %s2262_s18 }
 0xdd3   :  { %1500 = vrot.lane.b32.xlu2 %v2754_v53, %s2259_s13 }
 0xddb   :  { %1637 = vrot.lane.b32.xlu2 %v2746_v49, %s2260_s14 }
 0xde3   :  { %1665 = vrot.lane.b32.xlu2 %v2754_v53, %s2260_s14 }
 0xe07   :  { %v2835_v16 = vpop.f32.mrf.mxu0 }
 0xe0a   :  { %v1345_v58 = vpop.xlane.xlu0 %1344 }
 0xe0b   :  { %v1347_v59 = vsub.f32 %v1339_v43, %v1345_v58 }
 0xe0d   :  { %v1350_v60 = vmul.f32 1.442695, %v1347_v59 }
 0xe0f   :  { %2222 = vpow2.f32 %v1350_v60 }
 0xe15   :  { %v2223_v61 = vpop.eup %2222 }
 0xe16   :  { %v1355_v48 = vsel %vm247_vm13, %v2223_v61, 0.0 }
 0xe17   :  { %1356 = vadd.xlane.f32.xlu1 %v1355_v48 }
 0xe1b   :  { %v2841_v20 = vpop.f32.mrf.mxu0 }
 0xe26   :  { %v1534_v62 = vpop.xlane.xlu2 %1533 }
 0xe27   :  { %v1538_v23 = vsub.f32 %v1530_v55, %v1534_v62 }
 0xe29   :  { %v1540_v18 = vmul.f32 1.442695, %v1538_v23 }
 0xe2b   :  { %2224 = vpow2.f32 %v1540_v18 }
 0xe2e   :  { %v1389_v0 = vpop.permute.xlu2 %1388 }
 0xe2f   :  { %1409 = vmatpush.msrb.mxu2 %v1389_v0  ;;  %v2085_v0 = vld [vmem:[%s3009_s3 + $0x38] sm:$0xff] }
 0xe30   :  { %1639 = vrot.lane.b32.xlu1 %v2746_v49, %s2261_s15 }
 0xe31   :  { %2104 = vmatpush.xpose.msk.msra.mxu2 %vm247_vm13, %v1503_v1  ;;  %v2225_v25 = vpop.eup %2224 }
 0xe32   :  { %v1544_v36 = vsel %vm247_vm13, %v2225_v25, 0.0 }
 0xe33   :  { %1545 = vadd.xlane.f32.xlu0 %v1544_v36 }
 0xe36   :  { %v1501_v5 = vpop.permute.xlu2 %1500 }
 0xe38   :  { %1667 = vrot.lane.b32.xlu1 %v2754_v53, %s2261_s15 }
 0xe3e   :  { %v1638_v7 = vpop.permute.xlu2 %1637 }
 0xe46   :  { %v1666_v15 = vpop.permute.xlu2 %1665 }
 0xe47   :  { %1554 = vrot.lane.b32.xlu0 %v2746_v49, %s2263_s6 }
 0xe8a   :  { %v1357_v37 = vpop.xlane.xlu1 %1356 }
 0xe8b   :  { %2226 = vrcp.f32 %v1357_v37  ;;  %v1437_v37 = vpop.f32.mrf.mxu3 }
 0xe91   :  { %v2227_v3 = vpop.eup %2226 }
 0xe92   :  { %v1361_v4 = vmul.f32 %v2227_v3, %v2223_v61 }
 0xe94   :  { %2097 = vmatmul.msk.f32.vlgmr.msrb.gmra.mxu2 %vm247_vm13, %v1361_v4 }
 0xe9c   :  { %2105 = vmatmul.msk.f32.vlgmr.msra.gmra.mxu2 %vm247_vm13, %v1501_v5  ;;  %v1467_v5 = vadd.f32 %v2835_v16, %v1437_v37 }
 0xea2   :  { %v1640_v6 = vpop.permute.xlu1 %1639 }
 0xea3   :  { %2110 = vmatpush.xpose.msk.msra.mxu0 %vm247_vm13, %v1640_v6 }
 0xea6   :  { %2111 = vmatmul.msk.f32.vlgmr.msra.gmra.mxu0 %vm247_vm13, %v1638_v7  ;;  %v1546_v8 = vpop.xlane.xlu0 %1545 }
 0xea7   :  { %2228 = vrcp.f32 %v1546_v8 }
 0xeaa   :  { %v1668_v14 = vpop.permute.xlu1 %1667 }
 0xead   :  { %v2229_v9 = vpop.eup %2228 }
 0xeae   :  { %v1552_v11 = vmul.f32 %v2229_v9, %v2225_v25  ;;  %v1804_v9 = vperm.slane %v2737_v24, 3 }
 0xeb9   :  { %v1555_v13 = vpop.permute.xlu0 %1554 }
 0xeba   :  { %1575 = vmatpush.msrb.mxu1 %v1555_v13 }
 0xebb   :  { %2106 = vmatmul.msk.f32.vlgmr.msrb.gmra.mxu1 %vm247_vm13, %v1552_v11 }
 0xebc   :  { %2112 = vmatpush.xpose.msk.msra.mxu1 %vm247_vm13, %v1668_v14 }
 0xec0   :  { %1792 = vmatpush.msrb.mxu1 %v2085_v0 }
 0xec3   :  { %2113 = vmatmul.msk.f32.vlgmr.msra.gmra.mxu1 %vm247_vm13, %v1666_v15 }
 0xf17   :  { %v1411_v17 = vpop.f32.mrf.mxu2 }
 0xf18   :  { %2099 = vmatmul.msk.f32.gmra.mxu3 %vm247_vm13, %v1411_v17 }
 0xf1f   :  { %v1525_v21 = vpop.f32.mrf.mxu2 }
 0xf20   :  { %v1529_v10 = vmul.f32 0.35355338, %v1525_v21 }
 0xf22   :  { %v1531_v22 = vadd.f32 %v1529_v10, %v2500_v57 }
 0xf23   :  { %v1662_v46 = vpop.f32.mrf.mxu0 }
 0xf24   :  { %v1693_v12 = vmul.f32 0.35355338, %v1662_v46  ;;  %v1535_v26 = vsel %vm247_vm13, %v1531_v22, -inf }
 0xf25   :  { %1536 = vmax.xlane.f32.xlu1 %v1535_v26 }
 0xf26   :  { %v1695_v27 = vadd.f32 %v1693_v12, %v2500_v57 }
 0xf28   :  { %v1697_v28 = vsel %vm247_vm13, %v1695_v27, -inf }
 0xf29   :  { %1698 = vmax.xlane.f32.xlu2 %v1697_v28  ;;  %v2119_v28 = vld [vmem:[%s3010_s4 + $0x28] sm:$0xff] }
 0xf38   :  { %v1577_v52 = vpop.f32.mrf.mxu1 }
 0xf39   :  { %2108 = vmatmul.msk.f32.vlgmr.msra.gmra.mxu3 %vm247_vm13, %v1577_v52 }
 0xf40   :  { %v1690_v29 = vpop.f32.mrf.mxu1 }
 0xf41   :  { %v1694_v30 = vmul.f32 0.35355338, %v1690_v29  ;;  %v2118_v29 = vld [vmem:[%s3010_s4 + $0x20] sm:$0xff] }
 0xf43   :  { %v1696_v31 = vadd.f32 %v1694_v30, %v2500_v57 }
 0xf45   :  { %v1700_v32 = vsel %vm247_vm13, %v1696_v31, -inf }
 0xf46   :  { %1701 = vmax.xlane.f32.xlu0 %v1700_v32 }
 0xf5a   :  { %1719 = vrot.lane.b32.xlu0 %v2746_v49, %s2264_s19 }
 0xf98   :  { %v1537_v33 = vpop.xlane.xlu1 %1536 }
 0xf99   :  { %v1539_v34 = vsub.f32 %v1531_v22, %v1537_v33 }
 0xf9b   :  { %v1542_v35 = vmul.f32 1.442695, %v1539_v34  ;;  %v1440_v3 = vpop.f32.mrf.mxu3 }
 0xf9c   :  { %v1699_v38 = vpop.xlane.xlu2 %1698  ;;  %v1470_v14 = vadd.f32 %v2841_v20, %v1440_v3 }
 0xf9d   :  { %2230 = vpow2.f32 %v1542_v35  ;;  %v1703_v39 = vsub.f32 %v1695_v27, %v1699_v38  ;;  %v2121_v27 = vld [vmem:[%s3010_s4 + $0x38] sm:$0xff] }
 0xf9f   :  { %v1705_v40 = vmul.f32 1.442695, %v1703_v39 }
 0xfa1   :  { %2232 = vpow2.f32 %v1705_v40  ;;  %v2139_v40 = vld [vmem:[%s3011_s5 + $0xf8] sm:$0xff] }
 0xfa2   :  { %1932 = vmatpush.msrb.mxu3 %v2139_v40 }
 0xfa3   :  { %v2231_v41 = vpop.eup %2230 }
 0xfa4   :  { %v1547_v42 = vsel %vm247_vm13, %v2231_v41, 0.0 }
 0xfa5   :  { %1548 = vadd.xlane.f32.xlu1 %v1547_v42 }
 0xfa7   :  { %v2233_v43 = vpop.eup %2232 }
 0xfa8   :  { %v1709_v57 = vsel %vm247_vm13, %v2233_v43, 0.0 }
 0xfa9   :  { %1710 = vadd.xlane.f32.xlu2 %v1709_v57 }
 0xfb9   :  { %v1702_v44 = vpop.xlane.xlu0 %1701 }
 0xfba   :  { %v1704_v45 = vsub.f32 %v1696_v31, %v1702_v44  ;;  %v2137_v44 = vld [vmem:[%s3011_s5 + $0xe8] sm:$0xff] }
 0xfbc   :  { %v1707_v47 = vmul.f32 1.442695, %v1704_v45  ;;  %v1629_v4 = vpop.f32.mrf.mxu3 }
 0xfbd   :  { %v1635_v6 = vadd.f32 %v1629_v4, %v1467_v5 }
 0xfbe   :  { %2234 = vpow2.f32 %v1707_v47  ;;  %1580 = vrot.lane.b32.xlu1 %v2754_v53, %s2263_s6  ;;  %v2136_v47 = vld [vmem:[%s3011_s5 + $0xe0] sm:$0xff] }
 0xfc4   :  { %v2235_v49 = vpop.eup %2234 }
 0xfc5   :  { %v1712_v51 = vsel %vm247_vm13, %v2235_v49, 0.0 }
 0xfc6   :  { %1713 = vadd.xlane.f32.xlu2 %v1712_v51 }
 0xfcc   :  { %v1720_v60 = vpop.permute.xlu0 %1719 }
 0xfde   :  { %1745 = vrot.lane.b32.xlu2 %v2754_v53, %s2264_s19 }
0x1018   :  { %v1549_v54 = vpop.xlane.xlu1 %1548 }
0x1019   :  { %2236 = vrcp.f32 %v1549_v54 }
0x101c   :  { %v1711_v55 = vpop.xlane.xlu2 %1710 }
0x101d   :  { %2238 = vrcp.f32 %v1711_v55 }
0x101f   :  { %v2237_v56 = vpop.eup %2236 }
0x1020   :  { %v1553_v58 = vmul.f32 %v2237_v56, %v2231_v41  ;;  %v2138_v41 = vld [vmem:[%s3011_s5 + $0xf0] sm:$0xff] }
0x1021   :  { %1933 = vmatpush.msrb.mxu3 %v2138_v41 }
0x1023   :  { %v2239_v61 = vpop.eup %2238  ;;  %1934 = vmatpush.msrb.mxu3 %v2137_v44 }
0x1024   :  { %v1717_v48 = vmul.f32 %v2239_v61, %v2233_v43 }
0x1025   :  { %1935 = vmatpush.msrb.mxu3 %v2136_v47 }
0x1030   :  { %v1581_v59 = vpop.permute.xlu1 %1580 }
0x1031   :  { %1601 = vmatpush.msrb.mxu2 %v1581_v59 }
0x1032   :  { %2107 = vmatmul.msk.f32.vlgmr.msrb.gmra.mxu2 %vm247_vm13, %v1553_v58 }
0x1033   :  { %1740 = vmatpush.msra.mxu2 %v1720_v60 }
0x1035   :  { %1885 = vmatpush.msrb.mxu2 %v2121_v27  ;;  %v1964_v27 = vld [vmem:[%s3012_s7 + $0x38] sm:$0xff] }
0x1036   :  { %2012 = vmatpush.msra.mxu1 %v1964_v27 }
0x1039   :  { %v1714_v62 = vpop.xlane.xlu2 %1713 }
0x103a   :  { %2240 = vrcp.f32 %v1714_v62  ;;  %2114 = vmatmul.msk.f32.vlgmr.msra.gmra.mxu2 %vm247_vm13, %v1717_v48  ;;  %v1855_v48 = vperm.slane %v2737_v24, 4 }
0x1040   :  { %v2241_v23 = vpop.eup %2240 }
0x1041   :  { %v1718_v53 = vmul.f32 %v2241_v23, %v2235_v49  ;;  %v1746_v18 = vpop.permute.xlu2 %1745 }
0x1042   :  { %1766 = vmatpush.msrb.mxu0 %v1746_v18  ;;  %v1858_v18 = vperm.slane %v2737_v24, 5 }
0x1043   :  { %2115 = vmatmul.msk.f32.vlgmr.msrb.gmra.mxu0 %vm247_vm13, %v1718_v53 }
0x10b5   :  { %v1603_v1 = vpop.f32.mrf.mxu2 }
0x10b6   :  { %2109 = vmatmul.msk.f32.gmra.mxu3 %vm247_vm13, %v1603_v1 }
0x10bd   :  { %v1742_v25 = vpop.f32.mrf.mxu2 }
0x10be   :  { %2116 = vmatmul.msk.f32.vlgmr.msrb.gmra.mxu1 %vm247_vm13, %v1742_v25 }
0x10c0   :  { %v1768_v36 = vpop.f32.mrf.mxu0 }
0x10c6   :  { %2117 = vmatmul.msk.f32.gmra.mxu1 %vm247_vm13, %v1768_v36 }
0x1139   :  { %v1632_v13 = vpop.f32.mrf.mxu3 }
0x113a   :  { %v1636_v17 = vadd.f32 %v1632_v13, %v1470_v14  ;;  %v2132_v13 = vld [vmem:[%s3011_s5 + $0xc0] sm:$0xff]  ;;  %v2131_v14 = vld [vmem:[%s3011_s5 + $0xb8] sm:$0xff] }
0x113b   :  { %v1794_v7 = vpop.f32.mrf.mxu1 }
0x113c   :  { %v1800_v8 = vadd.f32 %v1794_v7, %v1635_v6 }
0x113e   :  { %v1802_v11 = vadd.f32 %v1800_v8, %v2703_v50  ;;  %v2135_v8 = vld [vmem:[%s3011_s5 + $0xd8] sm:$0xff] }
0x113f   :  { %1936 = vmatpush.msrb.mxu3 %v2135_v8 }
0x1140   :  { %v2872_v15 = vadd.f32 %v1804_v9, %v1802_v11  ;;  %v2133_v11 = vld [vmem:[%s3011_s5 + $0xc8] sm:$0xff] }
0x1142   :  { %v1807_v19 = vsel %vm144_vm5, %v2872_v15, 0.0  ;;  %v1815_v21 = vmul.f32 %v2872_v15, %v2872_v15 }
0x1143   :  { %v1797_v16 = vpop.f32.mrf.mxu1  ;;  %1808 = vadd.xlane.f32.xlu0 %v1807_v19  ;;  %v2129_v19 = vld [vmem:[%s3011_s5 + $0xa8] sm:$0xff] }
0x1144   :  { %v1801_v10 = vadd.f32 %v1797_v16, %v1636_v17  ;;  %v1817_v22 = vsel %vm144_vm5, %v1815_v21, 0.0  ;;  %v2130_v17 = vld [vmem:[%s3011_s5 + $0xb0] sm:$0xff]  ;;  %v2128_v21 = vld [vmem:[%s3011_s5 + $0xa0] sm:$0xff]  ;;  %v2127_v16 = vld [vmem:[%s3011_s5 + $0x98] sm:$0xff] }
0x1145   :  { %1818 = vadd.xlane.f32.xlu1 %v1817_v22  ;;  %v2125_v22 = vld [vmem:[%s3011_s5 + $0x88] sm:$0xff] }
0x1146   :  { %v1803_v50 = vadd.f32 %v1801_v10, %v2711_v63  ;;  %v2120_v63 = vld [vmem:[%s3010_s4 + $0x30] sm:$0xff] }
0x1147   :  { %1886 = vmatpush.msrb.mxu2 %v2120_v63  ;;  %v2126_v10 = vld [vmem:[%s3011_s5 + $0x90] sm:$0xff] }
0x1148   :  { %v2880_v46 = vadd.f32 %v1804_v9, %v1803_v50  ;;  %v2134_v9 = vld [vmem:[%s3011_s5 + $0xd0] sm:$0xff]  ;;  %v2124_v50 = vld [vmem:[%s3011_s5 + $0x80] sm:$0xff] }
0x1149   :  { %1887 = vmatpush.msrb.mxu2 %v2119_v28  ;;  %1937 = vmatpush.msrb.mxu3 %v2134_v9 }
0x114a   :  { %v1810_v20 = vsel %vm144_vm5, %v2880_v46, 0.0  ;;  %v1816_v12 = vmul.f32 %v2880_v46, %v2880_v46 }
0x114b   :  { %1811 = vadd.xlane.f32.xlu2 %v1810_v20  ;;  %1888 = vmatpush.msrb.mxu2 %v2118_v29  ;;  %v1866_v20 = vperm.slane %v2737_v24, 6 }
0x114c   :  { %v1820_v26 = vsel %vm144_vm5, %v1816_v12, 0.0  ;;  %1938 = vmatpush.msrb.mxu3 %v2133_v11 }
0x114d   :  { %1821 = vadd.xlane.f32.xlu0 %v1820_v26  ;;  %v1963_v26 = vld [vmem:[%s3012_s7 + $0x30] sm:$0xff] }
0x114e   :  { %1939 = vmatpush.msrb.mxu3 %v2132_v13  ;;  %1989 = vmatpush.msra.mxu0 %v1963_v26 }
0x1150   :  { %1940 = vmatpush.msrb.mxu3 %v2131_v14 }
0x1152   :  { %1941 = vmatpush.msrb.mxu3 %v2130_v17 }
0x1154   :  { %1942 = vmatpush.msrb.mxu3 %v2129_v19 }
0x1156   :  { %1943 = vmatpush.msrb.mxu3 %v2128_v21 }
0x1158   :  { %1944 = vmatpush.msrb.mxu3 %v2127_v16 }
0x115a   :  { %1945 = vmatpush.msrb.mxu3 %v2126_v10 }
0x115c   :  { %1946 = vmatpush.msrb.mxu3 %v2125_v22 }
0x115e   :  { %1947 = vmatpush.msrb.mxu3 %v2124_v50 }
0x11b6   :  { %v1809_v52 = vpop.xlane.xlu0 %1808 }
0x11b7   :  { %v1813_v30 = vmul.f32 %v1809_v52, %v2454_v2 }
0x11b8   :  { %v1819_v31 = vpop.xlane.xlu1 %1818 }
0x11b9   :  { %v1825_v32 = vmul.f32 %v1813_v30, %v1813_v30  ;;  %v1823_v33 = vmul.f32 %v1819_v31, %v2454_v2  ;;  %v1829_v61 = vsub.f32 %v2872_v15, %v1813_v30 }
0x11bb   :  { %v1827_v34 = vsub.f32 %v1823_v33, %v1825_v32 }
0x11bd   :  { %v1831_v35 = vadd.f32 1e-05, %v1827_v34 }
0x11be   :  { %v1812_v38 = vpop.xlane.xlu2 %1811 }
0x11bf   :  { %2242 = vrsqrt.f32 %v1831_v35  ;;  %v1814_v39 = vmul.f32 %v1812_v38, %v2454_v2  ;;  %vm1839_vm12 = vweird.f32 %v1831_v35 }
0x11c0   :  { %v1822_v42 = vpop.xlane.xlu0 %1821 }
0x11c1   :  { %v1826_v43 = vmul.f32 %v1814_v39, %v1814_v39  ;;  %v1824_v57 = vmul.f32 %v1822_v42, %v2454_v2  ;;  %v1830_v3 = vsub.f32 %v2880_v46, %v1814_v39 }
0x11c3   :  { %v1828_v45 = vsub.f32 %v1824_v57, %v1826_v43 }
0x11c5   :  { %v2243_v49 = vpop.eup %2242  ;;  %v1832_v51 = vadd.f32 1e-05, %v1828_v45 }
0x11c6   :  { %v1834_v54 = vmul.f32 %v2243_v49, %v1831_v35  ;;  %vm1840_vm11 = vweird.f32 %v2243_v49 }
0x11c7   :  { %2244 = vrsqrt.f32 %v1832_v51  ;;  %vm1841_vm13 = vmor %vm1839_vm12, %vm1840_vm11  ;;  %vm1849_vm15 = vweird.f32 %v1832_v51 }
0x11c8   :  { %v1835_v55 = vmul.f32 %v2243_v49, %v1834_v54  ;;  %v1962_v54 = vld [vmem:[%s3012_s7 + $0x28] sm:$0xff] }
0x11c9   :  { %2013 = vmatpush.msra.mxu1 %v1962_v54 }
0x11ca   :  { %v1836_v56 = vmul.f32 0.5, %v1835_v55  ;;  %v1959_v55 = vld [vmem:[%s3012_s7 + $0x10] sm:$0xff] }
0x11cc   :  { %v1837_v58 = vsub.f32 1.5, %v1836_v56  ;;  %v1960_v56 = vld [vmem:[%s3012_s7 + $0x18] sm:$0xff] }
0x11cd   :  { %v2245_v2 = vpop.eup %2244  ;;  %2014 = vmatpush.msra.mxu1 %v1960_v56 }
0x11ce   :  { %v1838_v59 = vmul.f32 %v2243_v49, %v1837_v58  ;;  %v1844_v60 = vmul.f32 %v2245_v2, %v1832_v51  ;;  %vm1850_vm14 = vweird.f32 %v2245_v2  ;;  %v1961_v51 = vld [vmem:[%s3012_s7 + $0x20] sm:$0xff] }
0x11cf   :  { %vm1851_vm0 = vmor %vm1849_vm15, %vm1850_vm14  ;;  %1990 = vmatpush.msra.mxu0 %v1961_v51  ;;  %v1957_v58 = vld [vmem:[%s3012_s7] sm:$0xff] }
0x11d0   :  { %v1842_v62 = vsel %vm1841_vm13, %v2243_v49, %v1838_v59  ;;  %v1845_v23 = vmul.f32 %v2245_v2, %v1844_v60  ;;  %v1931_v59 = vperm.slane %v2737_v24, 7  ;;  %v1965_v24 = vld [vmem:[%s3013_s9] sm:$0x3] }
0x11d1   :  { %v1853_v53 = vmul.f32 %v1842_v62, %v1829_v61  ;;  %1991 = vmatpush.msra.mxu0 %v1959_v55 }
0x11d2   :  { %v1846_v0 = vmul.f32 0.5, %v1845_v23 }
0x11d3   :  { %v1856_v1 = vmul.f32 %v1855_v48, %v1853_v53  ;;  %1992 = vmatpush.msra.mxu0 %v1957_v58 }
0x11d4   :  { %v1847_v25 = vsub.f32 1.5, %v1846_v0  ;;  %v1968_v0 = vperm.slane %v1965_v24, 1 }
0x11d5   :  { %v1859_v36 = vadd.f32 %v1858_v18, %v1856_v1 }
0x11d6   :  { %v1848_v37 = vmul.f32 %v2245_v2, %v1847_v25 }
0x11d7   :  { %2122 = vmatmul.msk.f32.vlgmr.msrb.gmra.mxu2 %vm144_vm5, %v1859_v36 }
0x11d8   :  { %v1852_v4 = vsel %vm1851_vm0, %v2245_v2, %v1848_v37  ;;  %v1958_v2 = vld [vmem:[%s3012_s7 + $0x8] sm:$0xff] }
0x11d9   :  { %v1854_v5 = vmul.f32 %v1852_v4, %v1830_v3  ;;  %2015 = vmatpush.msra.mxu1 %v1958_v2 }
0x11db   :  { %v1857_v6 = vmul.f32 %v1855_v48, %v1854_v5 }
0x11dd   :  { %v1860_v7 = vadd.f32 %v1858_v18, %v1857_v6  ;;  %v1967_v18 = vperm.slane %v1965_v24, 0 }
0x11df   :  { %2123 = vmatmul.msk.f32.gmra.mxu2 %vm144_vm5, %v1860_v7 }
0x125a   :  { %v1890_v12 = vpop.f32.mrf.mxu2 }
0x125b   :  { %v1891_v63 = vadd.f32 %v1890_v12, %v1866_v20 }
0x125d   :  { %v1898_v28 = vmul.f32 0.044715, %v1891_v63  ;;  %v1896_v42 = vmul.f32 0.5, %v1891_v63 }
0x125f   :  { %v1900_v52 = vmul.f32 %v1898_v28, %v1891_v63 }
0x1261   :  { %v1902_v29 = vmul.f32 %v1900_v52, %v1891_v63 }
0x1262   :  { %v1893_v30 = vpop.f32.mrf.mxu2 }
0x1263   :  { %v1894_v31 = vadd.f32 %v1893_v30, %v1866_v20  ;;  %v1904_v32 = vadd.f32 %v1902_v29, %v1891_v63 }
0x1265   :  { %v1906_v33 = vmul.f32 0.7978846, %v1904_v32  ;;  %v1899_v34 = vmul.f32 0.044715, %v1894_v31  ;;  %v1897_v45 = vmul.f32 0.5, %v1894_v31 }
0x1267   :  { %2246 = vtanh.f32 %v1906_v33  ;;  %v1901_v35 = vmul.f32 %v1899_v34, %v1894_v31 }
0x1269   :  { %v1903_v38 = vmul.f32 %v1901_v35, %v1894_v31 }
0x126b   :  { %v1905_v39 = vadd.f32 %v1903_v38, %v1894_v31 }
0x126d   :  { %v2247_v40 = vpop.eup %2246  ;;  %v1907_v41 = vmul.f32 0.7978846, %v1905_v39 }
0x126e   :  { %v1910_v43 = vadd.f32 1.0, %v2247_v40 }
0x126f   :  { %2248 = vtanh.f32 %v1907_v41 }
0x1270   :  { %v1912_v57 = vmul.f32 %v1910_v43, %v1896_v42 }
0x1272   :  { %1948 = vmatmul.f32.vlgmr.msrb.gmra.mxu3 %v1912_v57 }
0x1275   :  { %v2249_v44 = vpop.eup %2248 }
0x1276   :  { %v1911_v47 = vadd.f32 1.0, %v2249_v44 }
0x1278   :  { %v1913_v49 = vmul.f32 %v1911_v47, %v1897_v45 }
0x127a   :  { %1951 = vmatmul.f32.gmra.mxu3 %v1913_v49 }
0x12f5   :  { %v1949_v60 = vpop.f32.mrf.mxu3 }
0x12f6   :  { %v1950_v61 = vadd.f32 %v1949_v60, %v1931_v59 }
0x12f8   :  { %v1955_v48 = vadd.f32 %v1950_v61, %v2872_v15 }
0x12fa   :  { %2140 = vmatmul.msk.f32.vlgmr.msra.gmra.mxu0 %vm144_vm5, %v1955_v48  ;;  %2142 = vmatmul.msk.f32.vlgmr.msra.gmra.mxu1 %vm144_vm5, %v1955_v48 }
0x12fd   :  { %v1952_v62 = vpop.f32.mrf.mxu3 }
0x12fe   :  { %v1953_v23 = vadd.f32 %v1952_v62, %v1931_v59 }
0x1300   :  { %v1956_v53 = vadd.f32 %v1953_v23, %v2880_v46 }
0x1302   :  { %2141 = vmatmul.msk.f32.gmra.mxu0 %vm144_vm5, %v1956_v53  ;;  %2143 = vmatmul.msk.f32.gmra.mxu1 %vm144_vm5, %v1956_v53 }
0x1377   :  { %v1994_v1 = vpop.f32.mrf.mxu0  ;;  %v2017_v15 = vpop.f32.mrf.mxu1 }
0x1378   :  { %v1995_v25 = vadd.f32 %v1994_v1, %v1967_v18  ;;  %v2018_v36 = vadd.f32 %v2017_v15, %v1968_v0 }
0x137a   :  { %2023 = vst [vmem:[%s3014_s10] sm:$0xff] %v1995_v25 }
0x137b   :  { %2024 = vst [vmem:[%s3014_s10 + $0x8] sm:$0xff] %v2018_v36 }
0x137f   :  { %v1997_v46 = vpop.f32.mrf.mxu0  ;;  %v2020_v37 = vpop.f32.mrf.mxu1 }
0x1380   :  { %v1998_v3 = vadd.f32 %v1997_v46, %v1967_v18  ;;  %v2021_v4 = vadd.f32 %v2020_v37, %v1968_v0 }
0x1382   :  { %2025 = vst [vmem:[%s3014_s10 + $0x10] sm:$0xff] %v1998_v3 }
0x1383   :  { %2026 = vst [vmem:[%s3014_s10 + $0x18] sm:$0xff] %v2021_v4 }

</bundles_post_ra>
